<compile_context>
chip_gen: v7x
topology: tpu7x:2x2x1
jax: 0.10.0
libtpu: 0.0.40
codegen_flags: <defaults>
</compile_context>

<pallas_src>
import math

import jax
import jax.numpy as jnp
from jax.experimental import pallas as pl
from jax.experimental.pallas import tpu as pltpu

# ---- small "config" consistent with the BertLayer spec ----
BATCH, SEQ, HIDDEN = 2, 8, 32
NUM_HEADS = 4
HEAD_DIM = HIDDEN // NUM_HEADS
INTER = 64
NUM_LAYERS = 2
LN_EPS = 1e-12
_INV_SQRT_HD = 1.0 / math.sqrt(HEAD_DIM)
_INV_SQRT2 = 1.0 / math.sqrt(2.0)

# Set to jnp.bfloat16 at production dims (MXU peak dtype); f32 here for the 1e-4 parity check.
MATMUL_DTYPE = jnp.float32


def _mm(t):
    return t.astype(MATMUL_DTYPE)


def _layernorm(x, gamma, beta):  # f32 math (v5e has no bf16 VPU)
    mu = jnp.mean(x, axis=-1, keepdims=True)
    var = jnp.mean((x - mu) ** 2, axis=-1, keepdims=True)
    return (x - mu) * jax.lax.rsqrt(var + LN_EPS) * gamma + beta


def _gelu(x):  # exact (erf) GELU, matching torch.nn.GELU() default
    return 0.5 * x * (1.0 + jax.lax.erf(x * _INV_SQRT2))


# ------------- Pallas kernel: NUM_LAYERS BertLayers, one batch element per grid step -------------
def bert_encoder_kernel(x_ref, mask_ref,
                        wq_ref, bq_ref, wk_ref, bk_ref, wv_ref, bv_ref,
                        wo_ref, bo_ref, g1_ref, be1_ref,
                        wi_ref, bi_ref, w2_ref, b2_ref, g2_ref, be2_ref,
                        out_ref):
    """x_ref: (1,S,H) block for this batch element; mask_ref: (1,S,S) additive mask;
    per-layer weights stacked on leading L axis, QKV/O weights head-major; out_ref: (1,S,H)."""
    x = x_ref[0]                                                    # (S, H), stays VMEM-resident
    # broadcast mask over heads ONCE, hoisted above the layer loop (no CSE of broadcast_in_dim)
    mask = jnp.broadcast_to(mask_ref[...], (NUM_HEADS, SEQ, SEQ))   # (NH, S, S)

    for l in range(NUM_LAYERS):                                     # static layer loop
        # --- per-head Q/K/V projections: 3-D batched matmuls, no head relayout needed ---
        xb = jnp.broadcast_to(_mm(x), (NUM_HEADS, SEQ, HIDDEN))     # (NH, S, H)
        qh = jnp.einsum('gsh,ghd->gsd', xb, _mm(wq_ref[l]),
                        preferred_element_type=jnp.float32) + bq_ref[l]   # scale pre-folded
        kh = jnp.einsum('gsh,ghd->gsd', xb, _mm(wk_ref[l]),
                        preferred_element_type=jnp.float32) + bk_ref[l]
        vh = jnp.einsum('gsh,ghd->gsd', xb, _mm(wv_ref[l]),
                        preferred_element_type=jnp.float32) + bv_ref[l]   # (NH, S, HD)

        # --- attention scores + softmax (f32) ---
        s = jnp.einsum('gqd,gkd->gqk', _mm(qh), _mm(kh),
                       preferred_element_type=jnp.float32) + mask   # (NH, S, S)
        s = s - jnp.max(s, axis=-1, keepdims=True)
        p = jnp.exp(s)
        # attention-prob dropout is identity in eval mode; approx=True -> EUP when tolerance allows
        p = p * pl.reciprocal(jnp.sum(p, axis=-1, keepdims=True))

        ctx = jnp.einsum('gqk,gkd->gqd', _mm(p), _mm(vh),
                         preferred_element_type=jnp.float32)        # (NH, S, HD)

        # --- BertSelfOutput: per-head dense (head-major Wo) summed over heads + residual + LN ---
        attn = jnp.sum(jnp.einsum('gqd,gdh->gqh', _mm(ctx), _mm(wo_ref[l]),
                                  preferred_element_type=jnp.float32), axis=0) + bo_ref[l]
        h1 = _layernorm(attn + x, g1_ref[l], be1_ref[l])            # (S, H)

        # --- BertIntermediate: dense + GELU ---
        inter = _gelu(jnp.dot(_mm(h1), _mm(wi_ref[l]),
                              preferred_element_type=jnp.float32) + bi_ref[l])

        # --- BertOutput: dense + residual + LayerNorm ---
        out = jnp.dot(_mm(inter), _mm(w2_ref[l]),
                      preferred_element_type=jnp.float32) + b2_ref[l]
        x = _layernorm(out + h1, g2_ref[l], be2_ref[l])

    # only the final hidden state is written back to HBM
    out_ref[0] = x.astype(out_ref.dtype)


@jax.jit
def bert_encoder_pallas(x, mask, stacked):
    """Runs NUM_LAYERS BertLayers. x: (B,S,H); mask: (B,1,S,S) additive. Returns (B,S,H)."""
    B, S, H = x.shape
    mask3 = mask.reshape(B, S, S)   # un-broadcast; per-head broadcast happens inside the kernel

    in_specs = [
        pl.BlockSpec((1, S, H), lambda b: (b, 0, 0)),
        pl.BlockSpec((1, S, S), lambda b: (b, 0, 0)),
    ] + [
        # full weight blocks with a constant index -> DMA'd once, reused across grid steps
        pl.BlockSpec(w.shape, lambda b, nd=w.ndim: (0,) * nd) for w in stacked
    ]

    return pl.pallas_call(
        bert_encoder_kernel,
        grid=(B,),
        in_specs=in_specs,
        out_specs=pl.BlockSpec((1, S, H), lambda b: (b, 0, 0)),
        out_shape=jax.ShapeDtypeStruct((B, S, H), x.dtype),
        compiler_params=pltpu.CompilerParams(dimension_semantics=("parallel",)),
    )(x, mask3, *stacked)


# ------------------ deterministic parameter init (torch-Linear-like, synthetic) ------------------
def init_layer_params(key):
    ks = jax.random.split(key, 6)

    def lin(k, din, dout):
        k1, k2 = jax.random.split(k)
        w = jax.random.normal(k1, (din, dout), jnp.float32) * 0.02
        b = jax.random.normal(k2, (1, dout), jnp.float32) * 0.02
        return w, b

    wq, bq = lin(ks[0], HIDDEN, HIDDEN)
    wk, bk = lin(ks[1], HIDDEN, HIDDEN)
    wv, bv = lin(ks[2], HIDDEN, HIDDEN)
    wo, bo = lin(ks[3], HIDDEN, HIDDEN)
    g1 = jnp.ones((1, HIDDEN), jnp.float32)
    be1 = jnp.zeros((1, HIDDEN), jnp.float32)
    wi, bi = lin(ks[4], HIDDEN, INTER)
    w2, b2 = lin(ks[5], INTER, HIDDEN)
    g2 = jnp.ones((1, HIDDEN), jnp.float32)
    be2 = jnp.zeros((1, HIDDEN), jnp.float32)
    return (wq, bq, wk, bk, wv, bv, wo, bo, g1, be1, wi, bi, w2, b2, g2, be2)


def stack_layer_params(layer_params):
    """Host-side, one-time transform:
       * QKV weights -> head-major (NH, H, HD), biases -> (NH, 1, HD)
       * 1/sqrt(HEAD_DIM) folded into the Q weight + bias
       * output-proj weight -> head-major (NH, HD, H)
       * everything stacked along a leading L axis."""
    def w_heads(w):   # (H, NH*HD) -> (NH, H, HD)
        return w.reshape(HIDDEN, NUM_HEADS, HEAD_DIM).transpose(1, 0, 2)

    def b_heads(b):   # (1, NH*HD) -> (NH, 1, HD)
        return b.reshape(NUM_HEADS, 1, HEAD_DIM)

    def wo_heads(w):  # (NH*HD, H) -> (NH, HD, H)
        return w.reshape(NUM_HEADS, HEAD_DIM, HIDDEN)

    cols = [[] for _ in range(16)]
    for (wq, bq, wk, bk, wv, bv, wo, bo, g1, be1, wi, bi, w2, b2, g2, be2) in layer_params:
        vals = (w_heads(wq) * _INV_SQRT_HD, b_heads(bq) * _INV_SQRT_HD,
                w_heads(wk), b_heads(bk),
                w_heads(wv), b_heads(bv),
                wo_heads(wo), bo, g1, be1, wi, bi, w2, b2, g2, be2)
        for c, v in zip(cols, vals):
            c.append(v)
    return tuple(jnp.stack(c, axis=0) for c in cols)


# ------------------ pure-JAX reference (for correctness check) ------------------
def bert_layer_ref(x, mask, params):
    wq, bq, wk, bk, wv, bv, wo, bo, g1, be1, wi, bi, w2, b2, g2, be2 = params
    B, S, H = x.shape
    q = x @ wq + bq
    k = x @ wk + bk
    v = x @ wv + bv

    def split(t):
        return t.reshape(B, S, NUM_HEADS, HEAD_DIM).transpose(0, 2, 1, 3)

    Q, K, V = split(q), split(k), split(v)
    s = jnp.einsum('bhqd,bhkd->bhqk', Q, K) / math.sqrt(HEAD_DIM) + mask
    p = jax.nn.softmax(s, axis=-1)
    ctx = jnp.einsum('bhqk,bhkd->bhqd', p, V).transpose(0, 2, 1, 3).reshape(B, S, H)
    attn = ctx @ wo + bo
    h1 = _layernorm(attn + x, g1, be1)
    inter = _gelu(h1 @ wi + bi)
    out = inter @ w2 + b2
    return _layernorm(out + h1, g2, be2)


if __name__ == "__main__":
    key = jax.random.PRNGKey(0)
    keys = jax.random.split(key, 1 + NUM_LAYERS)
    x = jax.random.normal(keys[0], (BATCH, SEQ, HIDDEN), jnp.float32)
    # additive attention mask (all zeros == fully visible, matching mask=None semantics)
    mask = jnp.zeros((BATCH, 1, SEQ, SEQ), jnp.float32)
    layer_params = [init_layer_params(k) for k in keys[1:]]
    stacked = stack_layer_params(layer_params)

    out = bert_encoder_pallas(x, mask, stacked)
    out = jax.block_until_ready(out)

    # reference check (per-layer pure JAX)
    xr = x
    for params in layer_params:
        xr = bert_layer_ref(xr, mask, params)

    assert out.shape == (BATCH, SEQ, HIDDEN)
    max_err = float(jnp.max(jnp.abs(out - xr)))
    assert jnp.allclose(out, xr, atol=1e-4, rtol=1e-4), max_err
    print("KERNEL_OK")
</pallas_src>

<mosaic_0001>
module attributes {stable_mosaic.version = 11 : i64} {
  func.func @bert_encoder_kernel(%arg0: i32, %arg1: memref<1x8x32xf32, #tpu.memory_space<vmem>>, %arg2: memref<1x8x8xf32, #tpu.memory_space<vmem>>, %arg3: memref<2x4x32x8xf32, #tpu.memory_space<vmem>>, %arg4: memref<2x4x1x8xf32, #tpu.memory_space<vmem>>, %arg5: memref<2x4x32x8xf32, #tpu.memory_space<vmem>>, %arg6: memref<2x4x1x8xf32, #tpu.memory_space<vmem>>, %arg7: memref<2x4x32x8xf32, #tpu.memory_space<vmem>>, %arg8: memref<2x4x1x8xf32, #tpu.memory_space<vmem>>, %arg9: memref<2x4x8x32xf32, #tpu.memory_space<vmem>>, %arg10: memref<2x1x32xf32, #tpu.memory_space<vmem>>, %arg11: memref<2x1x32xf32, #tpu.memory_space<vmem>>, %arg12: memref<2x1x32xf32, #tpu.memory_space<vmem>>, %arg13: memref<2x32x64xf32, #tpu.memory_space<vmem>>, %arg14: memref<2x1x64xf32, #tpu.memory_space<vmem>>, %arg15: memref<2x64x32xf32, #tpu.memory_space<vmem>>, %arg16: memref<2x1x32xf32, #tpu.memory_space<vmem>>, %arg17: memref<2x1x32xf32, #tpu.memory_space<vmem>>, %arg18: memref<2x1x32xf32, #tpu.memory_space<vmem>>, %arg19: memref<1x8x32xf32, #tpu.memory_space<vmem>>) attributes {dimension_semantics = [#tpu.dimension_semantics<parallel>], iteration_bounds = array<i64: 2>, scalar_prefetch = 0 : i64, scratch_operands = 0 : i64, tpu.core_type = #tpu.core_type<tc>, window_params = [{transform_indices = @transform_0, window_bounds = array<i64: 1, 8, 32>}, {transform_indices = @transform_1, window_bounds = array<i64: 1, 8, 8>}, {pipeline_mode = #tpu.pipeline_mode<synchronous>, transform_indices = @transform_2, window_bounds = array<i64: 2, 4, 32, 8>}, {pipeline_mode = #tpu.pipeline_mode<synchronous>, transform_indices = @transform_3, window_bounds = array<i64: 2, 4, 1, 8>}, {pipeline_mode = #tpu.pipeline_mode<synchronous>, transform_indices = @transform_4, window_bounds = array<i64: 2, 4, 32, 8>}, {pipeline_mode = #tpu.pipeline_mode<synchronous>, transform_indices = @transform_5, window_bounds = array<i64: 2, 4, 1, 8>}, {pipeline_mode = #tpu.pipeline_mode<synchronous>, transform_indices = @transform_6, window_bounds = array<i64: 2, 4, 32, 8>}, {pipeline_mode = #tpu.pipeline_mode<synchronous>, transform_indices = @transform_7, window_bounds = array<i64: 2, 4, 1, 8>}, {pipeline_mode = #tpu.pipeline_mode<synchronous>, transform_indices = @transform_8, window_bounds = array<i64: 2, 4, 8, 32>}, {pipeline_mode = #tpu.pipeline_mode<synchronous>, transform_indices = @transform_9, window_bounds = array<i64: 2, 1, 32>}, {pipeline_mode = #tpu.pipeline_mode<synchronous>, transform_indices = @transform_10, window_bounds = array<i64: 2, 1, 32>}, {pipeline_mode = #tpu.pipeline_mode<synchronous>, transform_indices = @transform_11, window_bounds = array<i64: 2, 1, 32>}, {pipeline_mode = #tpu.pipeline_mode<synchronous>, transform_indices = @transform_12, window_bounds = array<i64: 2, 32, 64>}, {pipeline_mode = #tpu.pipeline_mode<synchronous>, transform_indices = @transform_13, window_bounds = array<i64: 2, 1, 64>}, {pipeline_mode = #tpu.pipeline_mode<synchronous>, transform_indices = @transform_14, window_bounds = array<i64: 2, 64, 32>}, {pipeline_mode = #tpu.pipeline_mode<synchronous>, transform_indices = @transform_15, window_bounds = array<i64: 2, 1, 32>}, {pipeline_mode = #tpu.pipeline_mode<synchronous>, transform_indices = @transform_16, window_bounds = array<i64: 2, 1, 32>}, {pipeline_mode = #tpu.pipeline_mode<synchronous>, transform_indices = @transform_17, window_bounds = array<i64: 2, 1, 32>}, {transform_indices = @transform_18, window_bounds = array<i64: 1, 8, 32>}]} {
    %c0 = arith.constant 0 : index
    %c0_0 = arith.constant 0 : index
    %c0_1 = arith.constant 0 : index
    %0 = vector.load %arg1[%c0, %c0_0, %c0_1] : memref<1x8x32xf32, #tpu.memory_space<vmem>>, vector<1x8x32xf32>
    %1 = vector.shape_cast %0 : vector<1x8x32xf32> to vector<8x32xf32>
    %c0_2 = arith.constant 0 : index
    %c0_3 = arith.constant 0 : index
    %c0_4 = arith.constant 0 : index
    %2 = vector.load %arg2[%c0_2, %c0_3, %c0_4] : memref<1x8x8xf32, #tpu.memory_space<vmem>>, vector<1x8x8xf32>
    %3 = vector.shape_cast %2 : vector<1x8x8xf32> to vector<1x8x8xf32>
    %4 = vector.broadcast %3 : vector<1x8x8xf32> to vector<4x8x8xf32>
    %5 = vector.shape_cast %1 : vector<8x32xf32> to vector<1x8x32xf32>
    %6 = vector.broadcast %5 : vector<1x8x32xf32> to vector<4x8x32xf32>
    %c0_5 = arith.constant 0 : index
    %c0_6 = arith.constant 0 : index
    %c0_7 = arith.constant 0 : index
    %c0_8 = arith.constant 0 : index
    %7 = vector.load %arg3[%c0_5, %c0_6, %c0_7, %c0_8] : memref<2x4x32x8xf32, #tpu.memory_space<vmem>>, vector<1x4x32x8xf32>
    %8 = vector.shape_cast %7 : vector<1x4x32x8xf32> to vector<4x32x8xf32>
    "tpu.trace_start"() <{level = 10 : i32, message = "gsh,ghd->gsd"}> : () -> ()
    %cst = arith.constant dense<0.000000e+00> : vector<4x8x8xf32>
    %9 = tpu.matmul %6, %8, %cst {dimension_numbers = #tpu.dot_dimension_numbers<[2], [1], [1], [2], [0, 0, 0, 1, 1, 2], [0], [0]>} : vector<4x8x32xf32>, vector<4x32x8xf32>, vector<4x8x8xf32> -> vector<4x8x8xf32>
    "tpu.trace_stop"() : () -> ()
    %c0_9 = arith.constant 0 : index
    %c0_10 = arith.constant 0 : index
    %c0_11 = arith.constant 0 : index
    %c0_12 = arith.constant 0 : index
    %10 = vector.load %arg4[%c0_9, %c0_10, %c0_11, %c0_12] : memref<2x4x1x8xf32, #tpu.memory_space<vmem>>, vector<1x4x1x8xf32>
    %11 = vector.shape_cast %10 : vector<1x4x1x8xf32> to vector<4x1x8xf32>
    %12 = vector.broadcast %11 : vector<4x1x8xf32> to vector<4x8x8xf32>
    %13 = arith.addf %9, %12 : vector<4x8x8xf32>
    %c0_13 = arith.constant 0 : index
    %c0_14 = arith.constant 0 : index
    %c0_15 = arith.constant 0 : index
    %c0_16 = arith.constant 0 : index
    %14 = vector.load %arg5[%c0_13, %c0_14, %c0_15, %c0_16] : memref<2x4x32x8xf32, #tpu.memory_space<vmem>>, vector<1x4x32x8xf32>
    %15 = vector.shape_cast %14 : vector<1x4x32x8xf32> to vector<4x32x8xf32>
    "tpu.trace_start"() <{level = 10 : i32, message = "gsh,ghd->gsd"}> : () -> ()
    %cst_17 = arith.constant dense<0.000000e+00> : vector<4x8x8xf32>
    %16 = tpu.matmul %6, %15, %cst_17 {dimension_numbers = #tpu.dot_dimension_numbers<[2], [1], [1], [2], [0, 0, 0, 1, 1, 2], [0], [0]>} : vector<4x8x32xf32>, vector<4x32x8xf32>, vector<4x8x8xf32> -> vector<4x8x8xf32>
    "tpu.trace_stop"() : () -> ()
    %c0_18 = arith.constant 0 : index
    %c0_19 = arith.constant 0 : index
    %c0_20 = arith.constant 0 : index
    %c0_21 = arith.constant 0 : index
    %17 = vector.load %arg6[%c0_18, %c0_19, %c0_20, %c0_21] : memref<2x4x1x8xf32, #tpu.memory_space<vmem>>, vector<1x4x1x8xf32>
    %18 = vector.shape_cast %17 : vector<1x4x1x8xf32> to vector<4x1x8xf32>
    %19 = vector.broadcast %18 : vector<4x1x8xf32> to vector<4x8x8xf32>
    %20 = arith.addf %16, %19 : vector<4x8x8xf32>
    %c0_22 = arith.constant 0 : index
    %c0_23 = arith.constant 0 : index
    %c0_24 = arith.constant 0 : index
    %c0_25 = arith.constant 0 : index
    %21 = vector.load %arg7[%c0_22, %c0_23, %c0_24, %c0_25] : memref<2x4x32x8xf32, #tpu.memory_space<vmem>>, vector<1x4x32x8xf32>
    %22 = vector.shape_cast %21 : vector<1x4x32x8xf32> to vector<4x32x8xf32>
    "tpu.trace_start"() <{level = 10 : i32, message = "gsh,ghd->gsd"}> : () -> ()
    %cst_26 = arith.constant dense<0.000000e+00> : vector<4x8x8xf32>
    %23 = tpu.matmul %6, %22, %cst_26 {dimension_numbers = #tpu.dot_dimension_numbers<[2], [1], [1], [2], [0, 0, 0, 1, 1, 2], [0], [0]>} : vector<4x8x32xf32>, vector<4x32x8xf32>, vector<4x8x8xf32> -> vector<4x8x8xf32>
    "tpu.trace_stop"() : () -> ()
    %c0_27 = arith.constant 0 : index
    %c0_28 = arith.constant 0 : index
    %c0_29 = arith.constant 0 : index
    %c0_30 = arith.constant 0 : index
    %24 = vector.load %arg8[%c0_27, %c0_28, %c0_29, %c0_30] : memref<2x4x1x8xf32, #tpu.memory_space<vmem>>, vector<1x4x1x8xf32>
    %25 = vector.shape_cast %24 : vector<1x4x1x8xf32> to vector<4x1x8xf32>
    %26 = vector.broadcast %25 : vector<4x1x8xf32> to vector<4x8x8xf32>
    %27 = arith.addf %23, %26 : vector<4x8x8xf32>
    "tpu.trace_start"() <{level = 10 : i32, message = "gqd,gkd->gqk"}> : () -> ()
    %cst_31 = arith.constant dense<0.000000e+00> : vector<4x8x8xf32>
    %28 = tpu.matmul %13, %20, %cst_31 {dimension_numbers = #tpu.dot_dimension_numbers<[2], [2], [1], [1], [0, 0, 0, 1, 1, 1], [0], [0]>} : vector<4x8x8xf32>, vector<4x8x8xf32>, vector<4x8x8xf32> -> vector<4x8x8xf32>
    "tpu.trace_stop"() : () -> ()
    %29 = arith.addf %28, %4 : vector<4x8x8xf32>
    %cst_32 = arith.constant dense<0xFF800000> : vector<4x8xf32>
    %30 = vector.multi_reduction <maximumf>, %29, %cst_32 [2] : vector<4x8x8xf32> to vector<4x8xf32>
    %31 = vector.shape_cast %30 : vector<4x8xf32> to vector<4x8x1xf32>
    %32 = vector.broadcast %31 : vector<4x8x1xf32> to vector<4x8x8xf32>
    %33 = arith.subf %29, %32 : vector<4x8x8xf32>
    %34 = math.exp %33 : vector<4x8x8xf32>
    %cst_33 = arith.constant dense<0.000000e+00> : vector<4x8xf32>
    %35 = vector.multi_reduction <add>, %34, %cst_33 [2] : vector<4x8x8xf32> to vector<4x8xf32>
    %36 = vector.shape_cast %35 : vector<4x8xf32> to vector<4x8x1xf32>
    %37 = tpu.reciprocal %36 : vector<4x8x1xf32> -> vector<4x8x1xf32>
    %38 = vector.broadcast %37 : vector<4x8x1xf32> to vector<4x8x8xf32>
    %39 = arith.mulf %34, %38 : vector<4x8x8xf32>
    "tpu.trace_start"() <{level = 10 : i32, message = "gqk,gkd->gqd"}> : () -> ()
    %cst_34 = arith.constant dense<0.000000e+00> : vector<4x8x8xf32>
    %40 = tpu.matmul %39, %27, %cst_34 {dimension_numbers = #tpu.dot_dimension_numbers<[2], [1], [1], [2], [0, 0, 0, 1, 1, 2], [0], [0]>} : vector<4x8x8xf32>, vector<4x8x8xf32>, vector<4x8x8xf32> -> vector<4x8x8xf32>
    "tpu.trace_stop"() : () -> ()
    %c0_35 = arith.constant 0 : index
    %c0_36 = arith.constant 0 : index
    %c0_37 = arith.constant 0 : index
    %c0_38 = arith.constant 0 : index
    %41 = vector.load %arg9[%c0_35, %c0_36, %c0_37, %c0_38] : memref<2x4x8x32xf32, #tpu.memory_space<vmem>>, vector<1x4x8x32xf32>
    %42 = vector.shape_cast %41 : vector<1x4x8x32xf32> to vector<4x8x32xf32>
    "tpu.trace_start"() <{level = 10 : i32, message = "gqd,gdh->gqh"}> : () -> ()
    %cst_39 = arith.constant dense<0.000000e+00> : vector<4x8x32xf32>
    %43 = tpu.matmul %40, %42, %cst_39 {dimension_numbers = #tpu.dot_dimension_numbers<[2], [1], [1], [2], [0, 0, 0, 1, 1, 2], [0], [0]>} : vector<4x8x8xf32>, vector<4x8x32xf32>, vector<4x8x32xf32> -> vector<4x8x32xf32>
    "tpu.trace_stop"() : () -> ()
    %cst_40 = arith.constant dense<0.000000e+00> : vector<8x32xf32>
    %44 = vector.multi_reduction <add>, %43, %cst_40 [0] : vector<4x8x32xf32> to vector<8x32xf32>
    %c0_41 = arith.constant 0 : index
    %c0_42 = arith.constant 0 : index
    %c0_43 = arith.constant 0 : index
    %45 = vector.load %arg10[%c0_41, %c0_42, %c0_43] : memref<2x1x32xf32, #tpu.memory_space<vmem>>, vector<1x1x32xf32>
    %46 = vector.shape_cast %45 : vector<1x1x32xf32> to vector<1x32xf32>
    %47 = vector.broadcast %46 : vector<1x32xf32> to vector<8x32xf32>
    %48 = arith.addf %44, %47 : vector<8x32xf32>
    %49 = arith.addf %48, %1 : vector<8x32xf32>
    %c0_44 = arith.constant 0 : index
    %c0_45 = arith.constant 0 : index
    %c0_46 = arith.constant 0 : index
    %50 = vector.load %arg11[%c0_44, %c0_45, %c0_46] : memref<2x1x32xf32, #tpu.memory_space<vmem>>, vector<1x1x32xf32>
    %51 = vector.shape_cast %50 : vector<1x1x32xf32> to vector<1x32xf32>
    %c0_47 = arith.constant 0 : index
    %c0_48 = arith.constant 0 : index
    %c0_49 = arith.constant 0 : index
    %52 = vector.load %arg12[%c0_47, %c0_48, %c0_49] : memref<2x1x32xf32, #tpu.memory_space<vmem>>, vector<1x1x32xf32>
    %53 = vector.shape_cast %52 : vector<1x1x32xf32> to vector<1x32xf32>
    %cst_50 = arith.constant dense<0.000000e+00> : vector<8xf32>
    %54 = vector.multi_reduction <add>, %49, %cst_50 [1] : vector<8x32xf32> to vector<8xf32>
    %55 = vector.shape_cast %54 : vector<8xf32> to vector<8x1xf32>
    %cst_51 = arith.constant 3.200000e+01 : f32
    %56 = vector.broadcast %cst_51 : f32 to vector<8x1xf32>
    %57 = arith.divf %55, %56 : vector<8x1xf32>
    %58 = vector.broadcast %57 : vector<8x1xf32> to vector<8x32xf32>
    %59 = arith.subf %49, %58 : vector<8x32xf32>
    %60 = arith.mulf %59, %59 : vector<8x32xf32>
    %cst_52 = arith.constant dense<0.000000e+00> : vector<8xf32>
    %61 = vector.multi_reduction <add>, %60, %cst_52 [1] : vector<8x32xf32> to vector<8xf32>
    %62 = vector.shape_cast %61 : vector<8xf32> to vector<8x1xf32>
    %cst_53 = arith.constant 3.200000e+01 : f32
    %63 = vector.broadcast %cst_53 : f32 to vector<8x1xf32>
    %64 = arith.divf %62, %63 : vector<8x1xf32>
    %65 = vector.broadcast %57 : vector<8x1xf32> to vector<8x32xf32>
    %66 = arith.subf %49, %65 : vector<8x32xf32>
    %cst_54 = arith.constant 9.99999996E-13 : f32
    %67 = vector.broadcast %cst_54 : f32 to vector<8x1xf32>
    %68 = arith.addf %64, %67 : vector<8x1xf32>
    %69 = math.rsqrt %68 : vector<8x1xf32>
    %70 = vector.broadcast %69 : vector<8x1xf32> to vector<8x32xf32>
    %71 = arith.mulf %66, %70 : vector<8x32xf32>
    %72 = vector.broadcast %51 : vector<1x32xf32> to vector<8x32xf32>
    %73 = arith.mulf %71, %72 : vector<8x32xf32>
    %74 = vector.broadcast %53 : vector<1x32xf32> to vector<8x32xf32>
    %75 = arith.addf %73, %74 : vector<8x32xf32>
    %c0_55 = arith.constant 0 : index
    %c0_56 = arith.constant 0 : index
    %c0_57 = arith.constant 0 : index
    %76 = vector.load %arg13[%c0_55, %c0_56, %c0_57] : memref<2x32x64xf32, #tpu.memory_space<vmem>>, vector<1x32x64xf32>
    %77 = vector.shape_cast %76 : vector<1x32x64xf32> to vector<32x64xf32>
    %cst_58 = arith.constant dense<0.000000e+00> : vector<8x64xf32>
    %78 = tpu.matmul %75, %77, %cst_58 {dimension_numbers = #tpu.dot_dimension_numbers<[1], [0], [0], [1], [0, 0, 1, 1], [], []>} : vector<8x32xf32>, vector<32x64xf32>, vector<8x64xf32> -> vector<8x64xf32>
    %c0_59 = arith.constant 0 : index
    %c0_60 = arith.constant 0 : index
    %c0_61 = arith.constant 0 : index
    %79 = vector.load %arg14[%c0_59, %c0_60, %c0_61] : memref<2x1x64xf32, #tpu.memory_space<vmem>>, vector<1x1x64xf32>
    %80 = vector.shape_cast %79 : vector<1x1x64xf32> to vector<1x64xf32>
    %81 = vector.broadcast %80 : vector<1x64xf32> to vector<8x64xf32>
    %82 = arith.addf %78, %81 : vector<8x64xf32>
    %cst_62 = arith.constant 5.000000e-01 : f32
    %83 = vector.broadcast %cst_62 : f32 to vector<8x64xf32>
    %84 = arith.mulf %83, %82 : vector<8x64xf32>
    %cst_63 = arith.constant 0.707106769 : f32
    %85 = vector.broadcast %cst_63 : f32 to vector<8x64xf32>
    %86 = arith.mulf %82, %85 : vector<8x64xf32>
    %87 = math.erf %86 : vector<8x64xf32>
    %cst_64 = arith.constant 1.000000e+00 : f32
    %88 = vector.broadcast %cst_64 : f32 to vector<8x64xf32>
    %89 = arith.addf %88, %87 : vector<8x64xf32>
    %90 = arith.mulf %84, %89 : vector<8x64xf32>
    %c0_65 = arith.constant 0 : index
    %c0_66 = arith.constant 0 : index
    %c0_67 = arith.constant 0 : index
    %91 = vector.load %arg15[%c0_65, %c0_66, %c0_67] : memref<2x64x32xf32, #tpu.memory_space<vmem>>, vector<1x64x32xf32>
    %92 = vector.shape_cast %91 : vector<1x64x32xf32> to vector<64x32xf32>
    %cst_68 = arith.constant dense<0.000000e+00> : vector<8x32xf32>
    %93 = tpu.matmul %90, %92, %cst_68 {dimension_numbers = #tpu.dot_dimension_numbers<[1], [0], [0], [1], [0, 0, 1, 1], [], []>} : vector<8x64xf32>, vector<64x32xf32>, vector<8x32xf32> -> vector<8x32xf32>
    %c0_69 = arith.constant 0 : index
    %c0_70 = arith.constant 0 : index
    %c0_71 = arith.constant 0 : index
    %94 = vector.load %arg16[%c0_69, %c0_70, %c0_71] : memref<2x1x32xf32, #tpu.memory_space<vmem>>, vector<1x1x32xf32>
    %95 = vector.shape_cast %94 : vector<1x1x32xf32> to vector<1x32xf32>
    %96 = vector.broadcast %95 : vector<1x32xf32> to vector<8x32xf32>
    %97 = arith.addf %93, %96 : vector<8x32xf32>
    %98 = arith.addf %97, %75 : vector<8x32xf32>
    %c0_72 = arith.constant 0 : index
    %c0_73 = arith.constant 0 : index
    %c0_74 = arith.constant 0 : index
    %99 = vector.load %arg17[%c0_72, %c0_73, %c0_74] : memref<2x1x32xf32, #tpu.memory_space<vmem>>, vector<1x1x32xf32>
    %100 = vector.shape_cast %99 : vector<1x1x32xf32> to vector<1x32xf32>
    %c0_75 = arith.constant 0 : index
    %c0_76 = arith.constant 0 : index
    %c0_77 = arith.constant 0 : index
    %101 = vector.load %arg18[%c0_75, %c0_76, %c0_77] : memref<2x1x32xf32, #tpu.memory_space<vmem>>, vector<1x1x32xf32>
    %102 = vector.shape_cast %101 : vector<1x1x32xf32> to vector<1x32xf32>
    %cst_78 = arith.constant dense<0.000000e+00> : vector<8xf32>
    %103 = vector.multi_reduction <add>, %98, %cst_78 [1] : vector<8x32xf32> to vector<8xf32>
    %104 = vector.shape_cast %103 : vector<8xf32> to vector<8x1xf32>
    %cst_79 = arith.constant 3.200000e+01 : f32
    %105 = vector.broadcast %cst_79 : f32 to vector<8x1xf32>
    %106 = arith.divf %104, %105 : vector<8x1xf32>
    %107 = vector.broadcast %106 : vector<8x1xf32> to vector<8x32xf32>
    %108 = arith.subf %98, %107 : vector<8x32xf32>
    %109 = arith.mulf %108, %108 : vector<8x32xf32>
    %cst_80 = arith.constant dense<0.000000e+00> : vector<8xf32>
    %110 = vector.multi_reduction <add>, %109, %cst_80 [1] : vector<8x32xf32> to vector<8xf32>
    %111 = vector.shape_cast %110 : vector<8xf32> to vector<8x1xf32>
    %cst_81 = arith.constant 3.200000e+01 : f32
    %112 = vector.broadcast %cst_81 : f32 to vector<8x1xf32>
    %113 = arith.divf %111, %112 : vector<8x1xf32>
    %114 = vector.broadcast %106 : vector<8x1xf32> to vector<8x32xf32>
    %115 = arith.subf %98, %114 : vector<8x32xf32>
    %cst_82 = arith.constant 9.99999996E-13 : f32
    %116 = vector.broadcast %cst_82 : f32 to vector<8x1xf32>
    %117 = arith.addf %113, %116 : vector<8x1xf32>
    %118 = math.rsqrt %117 : vector<8x1xf32>
    %119 = vector.broadcast %118 : vector<8x1xf32> to vector<8x32xf32>
    %120 = arith.mulf %115, %119 : vector<8x32xf32>
    %121 = vector.broadcast %100 : vector<1x32xf32> to vector<8x32xf32>
    %122 = arith.mulf %120, %121 : vector<8x32xf32>
    %123 = vector.broadcast %102 : vector<1x32xf32> to vector<8x32xf32>
    %124 = arith.addf %122, %123 : vector<8x32xf32>
    %125 = vector.shape_cast %124 : vector<8x32xf32> to vector<1x8x32xf32>
    %126 = vector.broadcast %125 : vector<1x8x32xf32> to vector<4x8x32xf32>
    %c1 = arith.constant 1 : index
    %c0_83 = arith.constant 0 : index
    %c0_84 = arith.constant 0 : index
    %c0_85 = arith.constant 0 : index
    %127 = vector.load %arg3[%c1, %c0_83, %c0_84, %c0_85] : memref<2x4x32x8xf32, #tpu.memory_space<vmem>>, vector<1x4x32x8xf32>
    %128 = vector.shape_cast %127 : vector<1x4x32x8xf32> to vector<4x32x8xf32>
    "tpu.trace_start"() <{level = 10 : i32, message = "gsh,ghd->gsd"}> : () -> ()
    %cst_86 = arith.constant dense<0.000000e+00> : vector<4x8x8xf32>
    %129 = tpu.matmul %126, %128, %cst_86 {dimension_numbers = #tpu.dot_dimension_numbers<[2], [1], [1], [2], [0, 0, 0, 1, 1, 2], [0], [0]>} : vector<4x8x32xf32>, vector<4x32x8xf32>, vector<4x8x8xf32> -> vector<4x8x8xf32>
    "tpu.trace_stop"() : () -> ()
    %c1_87 = arith.constant 1 : index
    %c0_88 = arith.constant 0 : index
    %c0_89 = arith.constant 0 : index
    %c0_90 = arith.constant 0 : index
    %130 = vector.load %arg4[%c1_87, %c0_88, %c0_89, %c0_90] : memref<2x4x1x8xf32, #tpu.memory_space<vmem>>, vector<1x4x1x8xf32>
    %131 = vector.shape_cast %130 : vector<1x4x1x8xf32> to vector<4x1x8xf32>
    %132 = vector.broadcast %131 : vector<4x1x8xf32> to vector<4x8x8xf32>
    %133 = arith.addf %129, %132 : vector<4x8x8xf32>
    %c1_91 = arith.constant 1 : index
    %c0_92 = arith.constant 0 : index
    %c0_93 = arith.constant 0 : index
    %c0_94 = arith.constant 0 : index
    %134 = vector.load %arg5[%c1_91, %c0_92, %c0_93, %c0_94] : memref<2x4x32x8xf32, #tpu.memory_space<vmem>>, vector<1x4x32x8xf32>
    %135 = vector.shape_cast %134 : vector<1x4x32x8xf32> to vector<4x32x8xf32>
    "tpu.trace_start"() <{level = 10 : i32, message = "gsh,ghd->gsd"}> : () -> ()
    %cst_95 = arith.constant dense<0.000000e+00> : vector<4x8x8xf32>
    %136 = tpu.matmul %126, %135, %cst_95 {dimension_numbers = #tpu.dot_dimension_numbers<[2], [1], [1], [2], [0, 0, 0, 1, 1, 2], [0], [0]>} : vector<4x8x32xf32>, vector<4x32x8xf32>, vector<4x8x8xf32> -> vector<4x8x8xf32>
    "tpu.trace_stop"() : () -> ()
    %c1_96 = arith.constant 1 : index
    %c0_97 = arith.constant 0 : index
    %c0_98 = arith.constant 0 : index
    %c0_99 = arith.constant 0 : index
    %137 = vector.load %arg6[%c1_96, %c0_97, %c0_98, %c0_99] : memref<2x4x1x8xf32, #tpu.memory_space<vmem>>, vector<1x4x1x8xf32>
    %138 = vector.shape_cast %137 : vector<1x4x1x8xf32> to vector<4x1x8xf32>
    %139 = vector.broadcast %138 : vector<4x1x8xf32> to vector<4x8x8xf32>
    %140 = arith.addf %136, %139 : vector<4x8x8xf32>
    %c1_100 = arith.constant 1 : index
    %c0_101 = arith.constant 0 : index
    %c0_102 = arith.constant 0 : index
    %c0_103 = arith.constant 0 : index
    %141 = vector.load %arg7[%c1_100, %c0_101, %c0_102, %c0_103] : memref<2x4x32x8xf32, #tpu.memory_space<vmem>>, vector<1x4x32x8xf32>
    %142 = vector.shape_cast %141 : vector<1x4x32x8xf32> to vector<4x32x8xf32>
    "tpu.trace_start"() <{level = 10 : i32, message = "gsh,ghd->gsd"}> : () -> ()
    %cst_104 = arith.constant dense<0.000000e+00> : vector<4x8x8xf32>
    %143 = tpu.matmul %126, %142, %cst_104 {dimension_numbers = #tpu.dot_dimension_numbers<[2], [1], [1], [2], [0, 0, 0, 1, 1, 2], [0], [0]>} : vector<4x8x32xf32>, vector<4x32x8xf32>, vector<4x8x8xf32> -> vector<4x8x8xf32>
    "tpu.trace_stop"() : () -> ()
    %c1_105 = arith.constant 1 : index
    %c0_106 = arith.constant 0 : index
    %c0_107 = arith.constant 0 : index
    %c0_108 = arith.constant 0 : index
    %144 = vector.load %arg8[%c1_105, %c0_106, %c0_107, %c0_108] : memref<2x4x1x8xf32, #tpu.memory_space<vmem>>, vector<1x4x1x8xf32>
    %145 = vector.shape_cast %144 : vector<1x4x1x8xf32> to vector<4x1x8xf32>
    %146 = vector.broadcast %145 : vector<4x1x8xf32> to vector<4x8x8xf32>
    %147 = arith.addf %143, %146 : vector<4x8x8xf32>
    "tpu.trace_start"() <{level = 10 : i32, message = "gqd,gkd->gqk"}> : () -> ()
    %cst_109 = arith.constant dense<0.000000e+00> : vector<4x8x8xf32>
    %148 = tpu.matmul %133, %140, %cst_109 {dimension_numbers = #tpu.dot_dimension_numbers<[2], [2], [1], [1], [0, 0, 0, 1, 1, 1], [0], [0]>} : vector<4x8x8xf32>, vector<4x8x8xf32>, vector<4x8x8xf32> -> vector<4x8x8xf32>
    "tpu.trace_stop"() : () -> ()
    %149 = arith.addf %148, %4 : vector<4x8x8xf32>
    %cst_110 = arith.constant dense<0xFF800000> : vector<4x8xf32>
    %150 = vector.multi_reduction <maximumf>, %149, %cst_110 [2] : vector<4x8x8xf32> to vector<4x8xf32>
    %151 = vector.shape_cast %150 : vector<4x8xf32> to vector<4x8x1xf32>
    %152 = vector.broadcast %151 : vector<4x8x1xf32> to vector<4x8x8xf32>
    %153 = arith.subf %149, %152 : vector<4x8x8xf32>
    %154 = math.exp %153 : vector<4x8x8xf32>
    %cst_111 = arith.constant dense<0.000000e+00> : vector<4x8xf32>
    %155 = vector.multi_reduction <add>, %154, %cst_111 [2] : vector<4x8x8xf32> to vector<4x8xf32>
    %156 = vector.shape_cast %155 : vector<4x8xf32> to vector<4x8x1xf32>
    %157 = tpu.reciprocal %156 : vector<4x8x1xf32> -> vector<4x8x1xf32>
    %158 = vector.broadcast %157 : vector<4x8x1xf32> to vector<4x8x8xf32>
    %159 = arith.mulf %154, %158 : vector<4x8x8xf32>
    "tpu.trace_start"() <{level = 10 : i32, message = "gqk,gkd->gqd"}> : () -> ()
    %cst_112 = arith.constant dense<0.000000e+00> : vector<4x8x8xf32>
    %160 = tpu.matmul %159, %147, %cst_112 {dimension_numbers = #tpu.dot_dimension_numbers<[2], [1], [1], [2], [0, 0, 0, 1, 1, 2], [0], [0]>} : vector<4x8x8xf32>, vector<4x8x8xf32>, vector<4x8x8xf32> -> vector<4x8x8xf32>
    "tpu.trace_stop"() : () -> ()
    %c1_113 = arith.constant 1 : index
    %c0_114 = arith.constant 0 : index
    %c0_115 = arith.constant 0 : index
    %c0_116 = arith.constant 0 : index
    %161 = vector.load %arg9[%c1_113, %c0_114, %c0_115, %c0_116] : memref<2x4x8x32xf32, #tpu.memory_space<vmem>>, vector<1x4x8x32xf32>
    %162 = vector.shape_cast %161 : vector<1x4x8x32xf32> to vector<4x8x32xf32>
    "tpu.trace_start"() <{level = 10 : i32, message = "gqd,gdh->gqh"}> : () -> ()
    %cst_117 = arith.constant dense<0.000000e+00> : vector<4x8x32xf32>
    %163 = tpu.matmul %160, %162, %cst_117 {dimension_numbers = #tpu.dot_dimension_numbers<[2], [1], [1], [2], [0, 0, 0, 1, 1, 2], [0], [0]>} : vector<4x8x8xf32>, vector<4x8x32xf32>, vector<4x8x32xf32> -> vector<4x8x32xf32>
    "tpu.trace_stop"() : () -> ()
    %cst_118 = arith.constant dense<0.000000e+00> : vector<8x32xf32>
    %164 = vector.multi_reduction <add>, %163, %cst_118 [0] : vector<4x8x32xf32> to vector<8x32xf32>
    %c1_119 = arith.constant 1 : index
    %c0_120 = arith.constant 0 : index
    %c0_121 = arith.constant 0 : index
    %165 = vector.load %arg10[%c1_119, %c0_120, %c0_121] : memref<2x1x32xf32, #tpu.memory_space<vmem>>, vector<1x1x32xf32>
    %166 = vector.shape_cast %165 : vector<1x1x32xf32> to vector<1x32xf32>
    %167 = vector.broadcast %166 : vector<1x32xf32> to vector<8x32xf32>
    %168 = arith.addf %164, %167 : vector<8x32xf32>
    %169 = arith.addf %168, %124 : vector<8x32xf32>
    %c1_122 = arith.constant 1 : index
    %c0_123 = arith.constant 0 : index
    %c0_124 = arith.constant 0 : index
    %170 = vector.load %arg11[%c1_122, %c0_123, %c0_124] : memref<2x1x32xf32, #tpu.memory_space<vmem>>, vector<1x1x32xf32>
    %171 = vector.shape_cast %170 : vector<1x1x32xf32> to vector<1x32xf32>
    %c1_125 = arith.constant 1 : index
    %c0_126 = arith.constant 0 : index
    %c0_127 = arith.constant 0 : index
    %172 = vector.load %arg12[%c1_125, %c0_126, %c0_127] : memref<2x1x32xf32, #tpu.memory_space<vmem>>, vector<1x1x32xf32>
    %173 = vector.shape_cast %172 : vector<1x1x32xf32> to vector<1x32xf32>
    %cst_128 = arith.constant dense<0.000000e+00> : vector<8xf32>
    %174 = vector.multi_reduction <add>, %169, %cst_128 [1] : vector<8x32xf32> to vector<8xf32>
    %175 = vector.shape_cast %174 : vector<8xf32> to vector<8x1xf32>
    %cst_129 = arith.constant 3.200000e+01 : f32
    %176 = vector.broadcast %cst_129 : f32 to vector<8x1xf32>
    %177 = arith.divf %175, %176 : vector<8x1xf32>
    %178 = vector.broadcast %177 : vector<8x1xf32> to vector<8x32xf32>
    %179 = arith.subf %169, %178 : vector<8x32xf32>
    %180 = arith.mulf %179, %179 : vector<8x32xf32>
    %cst_130 = arith.constant dense<0.000000e+00> : vector<8xf32>
    %181 = vector.multi_reduction <add>, %180, %cst_130 [1] : vector<8x32xf32> to vector<8xf32>
    %182 = vector.shape_cast %181 : vector<8xf32> to vector<8x1xf32>
    %cst_131 = arith.constant 3.200000e+01 : f32
    %183 = vector.broadcast %cst_131 : f32 to vector<8x1xf32>
    %184 = arith.divf %182, %183 : vector<8x1xf32>
    %185 = vector.broadcast %177 : vector<8x1xf32> to vector<8x32xf32>
    %186 = arith.subf %169, %185 : vector<8x32xf32>
    %cst_132 = arith.constant 9.99999996E-13 : f32
    %187 = vector.broadcast %cst_132 : f32 to vector<8x1xf32>
    %188 = arith.addf %184, %187 : vector<8x1xf32>
    %189 = math.rsqrt %188 : vector<8x1xf32>
    %190 = vector.broadcast %189 : vector<8x1xf32> to vector<8x32xf32>
    %191 = arith.mulf %186, %190 : vector<8x32xf32>
    %192 = vector.broadcast %171 : vector<1x32xf32> to vector<8x32xf32>
    %193 = arith.mulf %191, %192 : vector<8x32xf32>
    %194 = vector.broadcast %173 : vector<1x32xf32> to vector<8x32xf32>
    %195 = arith.addf %193, %194 : vector<8x32xf32>
    %c1_133 = arith.constant 1 : index
    %c0_134 = arith.constant 0 : index
    %c0_135 = arith.constant 0 : index
    %196 = vector.load %arg13[%c1_133, %c0_134, %c0_135] : memref<2x32x64xf32, #tpu.memory_space<vmem>>, vector<1x32x64xf32>
    %197 = vector.shape_cast %196 : vector<1x32x64xf32> to vector<32x64xf32>
    %cst_136 = arith.constant dense<0.000000e+00> : vector<8x64xf32>
    %198 = tpu.matmul %195, %197, %cst_136 {dimension_numbers = #tpu.dot_dimension_numbers<[1], [0], [0], [1], [0, 0, 1, 1], [], []>} : vector<8x32xf32>, vector<32x64xf32>, vector<8x64xf32> -> vector<8x64xf32>
    %c1_137 = arith.constant 1 : index
    %c0_138 = arith.constant 0 : index
    %c0_139 = arith.constant 0 : index
    %199 = vector.load %arg14[%c1_137, %c0_138, %c0_139] : memref<2x1x64xf32, #tpu.memory_space<vmem>>, vector<1x1x64xf32>
    %200 = vector.shape_cast %199 : vector<1x1x64xf32> to vector<1x64xf32>
    %201 = vector.broadcast %200 : vector<1x64xf32> to vector<8x64xf32>
    %202 = arith.addf %198, %201 : vector<8x64xf32>
    %cst_140 = arith.constant 5.000000e-01 : f32
    %203 = vector.broadcast %cst_140 : f32 to vector<8x64xf32>
    %204 = arith.mulf %203, %202 : vector<8x64xf32>
    %cst_141 = arith.constant 0.707106769 : f32
    %205 = vector.broadcast %cst_141 : f32 to vector<8x64xf32>
    %206 = arith.mulf %202, %205 : vector<8x64xf32>
    %207 = math.erf %206 : vector<8x64xf32>
    %cst_142 = arith.constant 1.000000e+00 : f32
    %208 = vector.broadcast %cst_142 : f32 to vector<8x64xf32>
    %209 = arith.addf %208, %207 : vector<8x64xf32>
    %210 = arith.mulf %204, %209 : vector<8x64xf32>
    %c1_143 = arith.constant 1 : index
    %c0_144 = arith.constant 0 : index
    %c0_145 = arith.constant 0 : index
    %211 = vector.load %arg15[%c1_143, %c0_144, %c0_145] : memref<2x64x32xf32, #tpu.memory_space<vmem>>, vector<1x64x32xf32>
    %212 = vector.shape_cast %211 : vector<1x64x32xf32> to vector<64x32xf32>
    %cst_146 = arith.constant dense<0.000000e+00> : vector<8x32xf32>
    %213 = tpu.matmul %210, %212, %cst_146 {dimension_numbers = #tpu.dot_dimension_numbers<[1], [0], [0], [1], [0, 0, 1, 1], [], []>} : vector<8x64xf32>, vector<64x32xf32>, vector<8x32xf32> -> vector<8x32xf32>
    %c1_147 = arith.constant 1 : index
    %c0_148 = arith.constant 0 : index
    %c0_149 = arith.constant 0 : index
    %214 = vector.load %arg16[%c1_147, %c0_148, %c0_149] : memref<2x1x32xf32, #tpu.memory_space<vmem>>, vector<1x1x32xf32>
    %215 = vector.shape_cast %214 : vector<1x1x32xf32> to vector<1x32xf32>
    %216 = vector.broadcast %215 : vector<1x32xf32> to vector<8x32xf32>
    %217 = arith.addf %213, %216 : vector<8x32xf32>
    %218 = arith.addf %217, %195 : vector<8x32xf32>
    %c1_150 = arith.constant 1 : index
    %c0_151 = arith.constant 0 : index
    %c0_152 = arith.constant 0 : index
    %219 = vector.load %arg17[%c1_150, %c0_151, %c0_152] : memref<2x1x32xf32, #tpu.memory_space<vmem>>, vector<1x1x32xf32>
    %220 = vector.shape_cast %219 : vector<1x1x32xf32> to vector<1x32xf32>
    %c1_153 = arith.constant 1 : index
    %c0_154 = arith.constant 0 : index
    %c0_155 = arith.constant 0 : index
    %221 = vector.load %arg18[%c1_153, %c0_154, %c0_155] : memref<2x1x32xf32, #tpu.memory_space<vmem>>, vector<1x1x32xf32>
    %222 = vector.shape_cast %221 : vector<1x1x32xf32> to vector<1x32xf32>
    %cst_156 = arith.constant dense<0.000000e+00> : vector<8xf32>
    %223 = vector.multi_reduction <add>, %218, %cst_156 [1] : vector<8x32xf32> to vector<8xf32>
    %224 = vector.shape_cast %223 : vector<8xf32> to vector<8x1xf32>
    %cst_157 = arith.constant 3.200000e+01 : f32
    %225 = vector.broadcast %cst_157 : f32 to vector<8x1xf32>
    %226 = arith.divf %224, %225 : vector<8x1xf32>
    %227 = vector.broadcast %226 : vector<8x1xf32> to vector<8x32xf32>
    %228 = arith.subf %218, %227 : vector<8x32xf32>
    %229 = arith.mulf %228, %228 : vector<8x32xf32>
    %cst_158 = arith.constant dense<0.000000e+00> : vector<8xf32>
    %230 = vector.multi_reduction <add>, %229, %cst_158 [1] : vector<8x32xf32> to vector<8xf32>
    %231 = vector.shape_cast %230 : vector<8xf32> to vector<8x1xf32>
    %cst_159 = arith.constant 3.200000e+01 : f32
    %232 = vector.broadcast %cst_159 : f32 to vector<8x1xf32>
    %233 = arith.divf %231, %232 : vector<8x1xf32>
    %234 = vector.broadcast %226 : vector<8x1xf32> to vector<8x32xf32>
    %235 = arith.subf %218, %234 : vector<8x32xf32>
    %cst_160 = arith.constant 9.99999996E-13 : f32
    %236 = vector.broadcast %cst_160 : f32 to vector<8x1xf32>
    %237 = arith.addf %233, %236 : vector<8x1xf32>
    %238 = math.rsqrt %237 : vector<8x1xf32>
    %239 = vector.broadcast %238 : vector<8x1xf32> to vector<8x32xf32>
    %240 = arith.mulf %235, %239 : vector<8x32xf32>
    %241 = vector.broadcast %220 : vector<1x32xf32> to vector<8x32xf32>
    %242 = arith.mulf %240, %241 : vector<8x32xf32>
    %243 = vector.broadcast %222 : vector<1x32xf32> to vector<8x32xf32>
    %244 = arith.addf %242, %243 : vector<8x32xf32>
    %c0_161 = arith.constant 0 : index
    %c0_162 = arith.constant 0 : index
    %c0_163 = arith.constant 0 : index
    %245 = vector.load %arg19[%c0_161, %c0_162, %c0_163] : memref<1x8x32xf32, #tpu.memory_space<vmem>>, vector<1x8x32xf32>
    %246 = vector.shape_cast %245 : vector<1x8x32xf32> to vector<8x32xf32>
    %247 = vector.shape_cast %244 : vector<8x32xf32> to vector<1x8x32xf32>
    tpu.vector_store %arg19[%c0_161, %c0_162, %c0_163], %247 {strides = array<i32>} : memref<1x8x32xf32, #tpu.memory_space<vmem>>, vector<1x8x32xf32>,
    return
  }
  func.func @transform_0(%arg0: i32) -> (i32, i32, i32) {
    %c0_i32 = arith.constant 0 : i32
    %c0_i32_0 = arith.constant 0 : i32
    %c0_i32_1 = arith.constant 0 : i32
    return %arg0, %c0_i32, %c0_i32_0 : i32, i32, i32
  }
  func.func @transform_1(%arg0: i32) -> (i32, i32, i32) {
    %c0_i32 = arith.constant 0 : i32
    %c0_i32_0 = arith.constant 0 : i32
    %c0_i32_1 = arith.constant 0 : i32
    return %arg0, %c0_i32, %c0_i32_0 : i32, i32, i32
  }
  func.func @transform_2(%arg0: i32) -> (i32, i32, i32, i32) {
    %c0_i32 = arith.constant 0 : i32
    %c0_i32_0 = arith.constant 0 : i32
    %c0_i32_1 = arith.constant 0 : i32
    %c0_i32_2 = arith.constant 0 : i32
    %c0_i32_3 = arith.constant 0 : i32
    return %c0_i32, %c0_i32_0, %c0_i32_1, %c0_i32_2 : i32, i32, i32, i32
  }
  func.func @transform_3(%arg0: i32) -> (i32, i32, i32, i32) {
    %c0_i32 = arith.constant 0 : i32
    %c0_i32_0 = arith.constant 0 : i32
    %c0_i32_1 = arith.constant 0 : i32
    %c0_i32_2 = arith.constant 0 : i32
    %c0_i32_3 = arith.constant 0 : i32
    return %c0_i32, %c0_i32_0, %c0_i32_1, %c0_i32_2 : i32, i32, i32, i32
  }
  func.func @transform_4(%arg0: i32) -> (i32, i32, i32, i32) {
    %c0_i32 = arith.constant 0 : i32
    %c0_i32_0 = arith.constant 0 : i32
    %c0_i32_1 = arith.constant 0 : i32
    %c0_i32_2 = arith.constant 0 : i32
    %c0_i32_3 = arith.constant 0 : i32
    return %c0_i32, %c0_i32_0, %c0_i32_1, %c0_i32_2 : i32, i32, i32, i32
  }
  func.func @transform_5(%arg0: i32) -> (i32, i32, i32, i32) {
    %c0_i32 = arith.constant 0 : i32
    %c0_i32_0 = arith.constant 0 : i32
    %c0_i32_1 = arith.constant 0 : i32
    %c0_i32_2 = arith.constant 0 : i32
    %c0_i32_3 = arith.constant 0 : i32
    return %c0_i32, %c0_i32_0, %c0_i32_1, %c0_i32_2 : i32, i32, i32, i32
  }
  func.func @transform_6(%arg0: i32) -> (i32, i32, i32, i32) {
    %c0_i32 = arith.constant 0 : i32
    %c0_i32_0 = arith.constant 0 : i32
    %c0_i32_1 = arith.constant 0 : i32
    %c0_i32_2 = arith.constant 0 : i32
    %c0_i32_3 = arith.constant 0 : i32
    return %c0_i32, %c0_i32_0, %c0_i32_1, %c0_i32_2 : i32, i32, i32, i32
  }
  func.func @transform_7(%arg0: i32) -> (i32, i32, i32, i32) {
    %c0_i32 = arith.constant 0 : i32
    %c0_i32_0 = arith.constant 0 : i32
    %c0_i32_1 = arith.constant 0 : i32
    %c0_i32_2 = arith.constant 0 : i32
    %c0_i32_3 = arith.constant 0 : i32
    return %c0_i32, %c0_i32_0, %c0_i32_1, %c0_i32_2 : i32, i32, i32, i32
  }
  func.func @transform_8(%arg0: i32) -> (i32, i32, i32, i32) {
    %c0_i32 = arith.constant 0 : i32
    %c0_i32_0 = arith.constant 0 : i32
    %c0_i32_1 = arith.constant 0 : i32
    %c0_i32_2 = arith.constant 0 : i32
    %c0_i32_3 = arith.constant 0 : i32
    return %c0_i32, %c0_i32_0, %c0_i32_1, %c0_i32_2 : i32, i32, i32, i32
  }
  func.func @transform_9(%arg0: i32) -> (i32, i32, i32) {
    %c0_i32 = arith.constant 0 : i32
    %c0_i32_0 = arith.constant 0 : i32
    %c0_i32_1 = arith.constant 0 : i32
    %c0_i32_2 = arith.constant 0 : i32
    return %c0_i32, %c0_i32_0, %c0_i32_1 : i32, i32, i32
  }
  func.func @transform_10(%arg0: i32) -> (i32, i32, i32) {
    %c0_i32 = arith.constant 0 : i32
    %c0_i32_0 = arith.constant 0 : i32
    %c0_i32_1 = arith.constant 0 : i32
    %c0_i32_2 = arith.constant 0 : i32
    return %c0_i32, %c0_i32_0, %c0_i32_1 : i32, i32, i32
  }
  func.func @transform_11(%arg0: i32) -> (i32, i32, i32) {
    %c0_i32 = arith.constant 0 : i32
    %c0_i32_0 = arith.constant 0 : i32
    %c0_i32_1 = arith.constant 0 : i32
    %c0_i32_2 = arith.constant 0 : i32
    return %c0_i32, %c0_i32_0, %c0_i32_1 : i32, i32, i32
  }
  func.func @transform_12(%arg0: i32) -> (i32, i32, i32) {
    %c0_i32 = arith.constant 0 : i32
    %c0_i32_0 = arith.constant 0 : i32
    %c0_i32_1 = arith.constant 0 : i32
    %c0_i32_2 = arith.constant 0 : i32
    return %c0_i32, %c0_i32_0, %c0_i32_1 : i32, i32, i32
  }
  func.func @transform_13(%arg0: i32) -> (i32, i32, i32) {
    %c0_i32 = arith.constant 0 : i32
    %c0_i32_0 = arith.constant 0 : i32
    %c0_i32_1 = arith.constant 0 : i32
    %c0_i32_2 = arith.constant 0 : i32
    return %c0_i32, %c0_i32_0, %c0_i32_1 : i32, i32, i32
  }
  func.func @transform_14(%arg0: i32) -> (i32, i32, i32) {
    %c0_i32 = arith.constant 0 : i32
    %c0_i32_0 = arith.constant 0 : i32
    %c0_i32_1 = arith.constant 0 : i32
    %c0_i32_2 = arith.constant 0 : i32
    return %c0_i32, %c0_i32_0, %c0_i32_1 : i32, i32, i32
  }
  func.func @transform_15(%arg0: i32) -> (i32, i32, i32) {
    %c0_i32 = arith.constant 0 : i32
    %c0_i32_0 = arith.constant 0 : i32
    %c0_i32_1 = arith.constant 0 : i32
    %c0_i32_2 = arith.constant 0 : i32
    return %c0_i32, %c0_i32_0, %c0_i32_1 : i32, i32, i32
  }
  func.func @transform_16(%arg0: i32) -> (i32, i32, i32) {
    %c0_i32 = arith.constant 0 : i32
    %c0_i32_0 = arith.constant 0 : i32
    %c0_i32_1 = arith.constant 0 : i32
    %c0_i32_2 = arith.constant 0 : i32
    return %c0_i32, %c0_i32_0, %c0_i32_1 : i32, i32, i32
  }
  func.func @transform_17(%arg0: i32) -> (i32, i32, i32) {
    %c0_i32 = arith.constant 0 : i32
    %c0_i32_0 = arith.constant 0 : i32
    %c0_i32_1 = arith.constant 0 : i32
    %c0_i32_2 = arith.constant 0 : i32
    return %c0_i32, %c0_i32_0, %c0_i32_1 : i32, i32, i32
  }
  func.func @transform_18(%arg0: i32) -> (i32, i32, i32) {
    %c0_i32 = arith.constant 0 : i32
    %c0_i32_0 = arith.constant 0 : i32
    %c0_i32_1 = arith.constant 0 : i32
    return %arg0, %c0_i32, %c0_i32_0 : i32, i32, i32
  }
}

</mosaic_0001>

<bundles_post_ra>
// kernel: bert_encoder_pallas.1
= control target key start
LH: loop header
LB: loop body
LE: loop exit
PB: predicated region body
PF: predicated region fallthrough
CT: control target
= control target key end

     0   :  { %s7224_s0 = inlined_call_operand.vmem [shape: f32[2,8,32], index: 0, kind: input, shape index: {}]   ;;  %s7225_s1 = inlined_call_operand.vmem [shape: f32[2,8,8], index: 1, kind: input, shape index: {}]   ;;  %s7226_s2 = inlined_call_operand.vmem [shape: f32[2,4,32,8], index: 2, kind: input, shape index: {}]   ;;  %s7227_s3 = inlined_call_operand.vmem [shape: f32[2,4,1,8], index: 3, kind: input, shape index: {}]   ;;  %s7228_s4 = inlined_call_operand.vmem [shape: f32[2,4,32,8], index: 4, kind: input, shape index: {}]   ;;  %s7229_s5 = inlined_call_operand.vmem [shape: f32[2,4,1,8], index: 5, kind: input, shape index: {}]   ;;  %s7230_s6 = inlined_call_operand.vmem [shape: f32[2,4,32,8], index: 6, kind: input, shape index: {}]   ;;  %s7231_s7 = inlined_call_operand.vmem [shape: f32[2,4,1,8], index: 7, kind: input, shape index: {}]   ;;  %s7232_s8 = inlined_call_operand.vmem [shape: f32[2,4,8,32], index: 8, kind: input, shape index: {}]   ;;  %s7233_s9 = inlined_call_operand.vmem [shape: f32[2,1,32], index: 9, kind: input, shape index: {}]   ;;  %s7234_s10 = inlined_call_operand.vmem [shape: f32[2,1,32], index: 10, kind: input, shape index: {}]   ;;  %s7235_s11 = inlined_call_operand.vmem [shape: f32[2,1,32], index: 11, kind: input, shape index: {}]   ;;  %s7236_s12 = inlined_call_operand.vmem [shape: f32[2,32,64], index: 12, kind: input, shape index: {}]   ;;  %s7237_s13 = inlined_call_operand.vmem [shape: f32[2,1,64], index: 13, kind: input, shape index: {}]   ;;  %s7238_s14 = inlined_call_operand.vmem [shape: f32[2,64,32], index: 14, kind: input, shape index: {}]   ;;  %s7239_s15 = inlined_call_operand.vmem [shape: f32[2,1,32], index: 15, kind: input, shape index: {}]   ;;  %s7240_s16 = inlined_call_operand.vmem [shape: f32[2,1,32], index: 16, kind: input, shape index: {}]   ;;  %s7241_s17 = inlined_call_operand.vmem [shape: f32[2,1,32], index: 17, kind: input, shape index: {}]   ;;  %s7242_s18 = inlined_call_operand.hbm [shape: f32[2,8,32], index: 18, kind: output, shape index: {}]  }
   0x1   :  { %7251 = sst [smem:[#allocation11_spill]] %s7224_s0 }
   0x2   :  { %7252 = sst [smem:[#allocation12_spill]] %s7225_s1 }
   0x3   :  { %7253 = sst [smem:[#allocation13_spill]] %s7226_s2 }
   0x4   :  { %7254 = sst [smem:[#allocation14_spill]] %s7227_s3 }
   0x5   :  { %7255 = sst [smem:[#allocation15_spill]] %s7242_s18 }
   0x6   :  { %23 = vsyncpa [#allocation3], 0 }
   0x7   :  { %25 = vsyncpa [#allocation3 + $0x1], 0  ;;  %s6283_s27 = smov 0   ;;  %s6285_s28 = smov 0  }
   0x8   :  { %s6287_s29 = smov 0   ;;  %s6289_s30 = smov 0  }
   0x9 LB: > { %7256 = sst [smem:[#allocation5_spill]] %s6170_s27  ;;  %s6304_s0 = sadd.s32 4294967295, %s6182_s30   ;;  %s6182_s30 = sphi %s6289_s30, %s7272_s30   ;;  %s6178_s29 = sphi %s6287_s29, %s7274_s29   ;;  %s6174_s28 = sphi %s6285_s28, %s7276_s28   ;;  %s6170_s27 = sphi %s6283_s27, %s7275_s27  }
   0xa   : > { %7257 = sst [smem:[#allocation6_spill]] %s6178_s29  ;;  %s5022_s19 = sadd.s32 4294967294, %s6182_s30  }
   0xb   : > { %7258 = sst [smem:[#allocation7_spill]] %s6182_s30  ;;  %s6308_s1 = sadd.s32 1, %s6182_s30  }
   0xc   : > { %7259 = sst [smem:[#allocation8_spill]] %s6308_s1  ;;  %s426_s20 = sadd.s32 1, %s6178_s29 }
   0xd   : > { %s423_s21 = ssub.s32 %s6182_s30, %s6308_s1  ;;  %p436_p0 = scmp.ne.s32.totalorder %s6178_s29, %s6174_s28 }
   0xe   : > { %p424_p1 = scmp.eq.s32.totalorder %s423_s21, 0  ;;  %p437_p2 = scmp.eq.s32.totalorder %s6304_s0, 1 }
   0xf   : > { %p442_p3 = scmp.ne.s32.totalorder %s6174_s28, %s6170_s27  ;;  %p443_p4 = scmp.eq.s32.totalorder %s5022_s19, 1 }
  0x10   : > { %s6319_s22 = scalar_select %p424_p1, %s6178_s29, %s426_s20  }
  0x11   : > { %p6321_p5 = por %p437_p2, %p436_p0  ;;  %p6325_p6 = por %p443_p4, %p442_p3 }
  0x12   : > { %7260 = sst [smem:[#allocation9_spill]] %s6319_s22  ;;  %p5025_p7 = scmp.ge.s32.totalorder %s6182_s30, 1 }
  0x13   : > { %s7262_s23 = scalar_select %p6325_p6, 1, 0 }
  0x14   : > { %p523_p8 = scmp.lt.s32.totalorder %s6182_s30, 3 }
  0x15   : > { %7263 = sst [smem:[#allocation10_spill]] %s7262_s23 }
  0x16   : > { %p524_p9 = pnand %p5025_p7, %p523_p8 }
  0x17   : > { %s7264_s26 = sld [smem:[#allocation13_spill]] (!%p524_p9)  ;;  %v6184_v3 = vmov (!%p524_p9), 0.0|0.0   ;;  %p580_p10 = scmp.lt.s32.totalorder (!%p524_p9), %s6304_s0, 1  ;;  %vm6185_vm0 = vmmov (!%p524_p9), 0   ;;  %v6186_v11 = vmov (!%p524_p9), 0.0   ;;  %vm634_vm1 = vcmask (!%p524_p9), 261120  }
  0x18   : > { %527 = sbr.rel (%p524_p9) target bundleno = 4611 (0x1203), region = 92  ;;  %5854 = vmatprep.subr.bf16.mxu0 (!%p524_p9), %v6184_v3  ;;  %5860 = vmatprep.subr.bf16.mxu1 (!%p524_p9), %v6184_v3  ;;  %s7265_s27 = sld [smem:[#allocation11_spill]] (!%p524_p9)  ;;  %v918_v27 = vld [vmem:[%s7228_s4] sm:$0xff] (!%p524_p9)  ;;  %v919_v28 = vld [vmem:[%s7228_s4 + $0x8] sm:$0xff] (!%p524_p9)  ;;  %v920_v33 = vld [vmem:[%s7228_s4 + $0x10] sm:$0xff] (!%p524_p9)  ;;  %vm1566_vm2 = vcmask (!%p524_p9), 64512  }
  0x19   : > { %5418 = vmatprep.mubr.msk.f32.mxu0 (!%p524_p9), %vm6185_vm0, %v6186_v11  ;;  %5429 = vmatprep.mubr.msk.f32.mxu1 (!%p524_p9), %vm6185_vm0, %v6186_v11  ;;  %v922_v29 = vld [vmem:[%s7228_s4 + $0x20] sm:$0xff] (!%p524_p9)  ;;  %v923_v30 = vld [vmem:[%s7228_s4 + $0x28] sm:$0xff] (!%p524_p9)  ;;  %v5879_v31 = vpack.c.bf16 (!%p524_p9), %v919_v28, %v918_v27  ;;  %v921_v34 = vld [vmem:[%s7228_s4 + $0x18] sm:$0xff] (!%p524_p9)  ;;  %s7266_s3 = sld [smem:[#allocation14_spill]] (!%p524_p9)  ;;  %s7267_s18 = sld [smem:[#allocation12_spill]] (!%p524_p9)  ;;  %vm2653_vm3 = vcmask (!%p524_p9), 523264  }
  0x1a   : > { %v5885_v32 = vpack.c.bf16 (!%p524_p9), %v923_v30, %v922_v29  ;;  %v924_v35 = vld [vmem:[%s7228_s4 + $0x30] sm:$0xff] (!%p524_p9)  ;;  %v925_v36 = vld [vmem:[%s7228_s4 + $0x38] sm:$0xff] (!%p524_p9)  ;;  %v5882_v37 = vpack.c.bf16 (!%p524_p9), %v921_v34, %v920_v33  ;;  %v926_v39 = vld [vmem:[%s7228_s4 + $0x40] sm:$0xff] (!%p524_p9)  ;;  %s577_s19 = sand.u32 (!%p524_p9), 1, %s6174_s28   ;;  %s5211_s22 = sshll.u32 (!%p524_p9), %s6304_s0, 7 }
  0x1b   : > { %v5888_v38 = vpack.c.bf16 (!%p524_p9), %v925_v36, %v924_v35  ;;  %v927_v40 = vld [vmem:[%s7228_s4 + $0x48] sm:$0xff] (!%p524_p9)  ;;  %v930_v41 = vld [vmem:[%s7228_s4 + $0x60] sm:$0xff] (!%p524_p9)  ;;  %v928_v45 = vld [vmem:[%s7228_s4 + $0x50] sm:$0xff] (!%p524_p9)  ;;  %s5026_s20 = sshll.u32 (!%p524_p9), %s577_s19, 3  ;;  %s7268_s24 = sld [smem:[#allocation15_spill]] (!%p524_p9) }
  0x1c   : > { %v931_v42 = vld [vmem:[%s7228_s4 + $0x68] sm:$0xff] (!%p524_p9)  ;;  %v5891_v43 = vpack.c.bf16 (!%p524_p9), %v927_v40, %v926_v39  ;;  %v929_v46 = vld [vmem:[%s7228_s4 + $0x58] sm:$0xff] (!%p524_p9)  ;;  %v932_v47 = vld [vmem:[%s7228_s4 + $0x70] sm:$0xff] (!%p524_p9)  ;;  %s579_s21 = scalar_lea.vmem (!%p524_p9), [#allocation2], %s5026_s20 }
  0x1d   : > { %v590_v0 = vld [vmem:[%s7264_s26] sm:$0xff] (!%p524_p9)  ;;  %v591_v1 = vld [vmem:[%s7264_s26 + $0x8] sm:$0xff] (!%p524_p9)  ;;  %v592_v6 = vld [vmem:[%s7264_s26 + $0x10] sm:$0xff] (!%p524_p9)  ;;  %v5897_v44 = vpack.c.bf16 (!%p524_p9), %v931_v42, %v930_v41  ;;  %v5894_v49 = vpack.c.bf16 (!%p524_p9), %v929_v46, %v928_v45 }
  0x1e   : > { %v594_v2 = vld [vmem:[%s7264_s26 + $0x20] sm:$0xff] (!%p524_p9)  ;;  %v5855_v4 = vpack.c.bf16 (!%p524_p9), %v591_v1, %v590_v0  ;;  %v595_v5 = vld [vmem:[%s7264_s26 + $0x28] sm:$0xff] (!%p524_p9)  ;;  %v593_v7 = vld [vmem:[%s7264_s26 + $0x18] sm:$0xff] (!%p524_p9) }
  0x1f   : > { %v5861_v8 = vpack.c.bf16 %v595_v5, %v594_v2  ;;  %v596_v9 = vld [vmem:[%s7264_s26 + $0x30] sm:$0xff]  ;;  %v597_v10 = vld [vmem:[%s7264_s26 + $0x38] sm:$0xff]  ;;  %v5858_v12 = vpack.c.bf16 %v593_v7, %v592_v6  ;;  %s6363_s29 = scalar_select %p580_p10, %s6304_s0, 1  ;;  %v598_v14 = vld [vmem:[%s7264_s26 + $0x40] sm:$0xff] }
  0x20   : > { %5856 = vmatpush3.bf16.msra.mxu0 %v5855_v4  ;;  %v5864_v13 = vpack.c.bf16 %v597_v10, %v596_v9  ;;  %v599_v15 = vld [vmem:[%s7264_s26 + $0x48] sm:$0xff]  ;;  %v602_v16 = vld [vmem:[%s7264_s26 + $0x60] sm:$0xff]  ;;  %v600_v21 = vld [vmem:[%s7264_s26 + $0x50] sm:$0xff]  ;;  %s6187_s0 = smov [#allocation2]  }
  0x21   : > { %5862 = vmatpush3.bf16.msra.mxu1 %v5861_v8  ;;  %5857 = vmatprep.subr.bf16.mxu0 %v6184_v3  ;;  %s5027_s25 = sshll.u32 %s6363_s29, 3  ;;  %v603_v17 = vld [vmem:[%s7264_s26 + $0x68] sm:$0xff]  ;;  %v5867_v19 = vpack.c.bf16 %v599_v15, %v598_v14  ;;  %v601_v22 = vld [vmem:[%s7264_s26 + $0x58] sm:$0xff]  ;;  %v604_v23 = vld [vmem:[%s7264_s26 + $0x70] sm:$0xff]  ;;  %s6124_s20 = sshll.u32 %s6187_s0, 4  ;;  %s6125_s20 = int_to_ptr.vmem [resolvable:$false] %s6124_s20 }
  0x22   : > { %5863 = vmatprep.subr.bf16.mxu1 %v6184_v3  ;;  %s583_s1 = scalar_lea.vmem %s7265_s27, %s5027_s25  ;;  %v5873_v20 = vpack.c.bf16 %v603_v17, %v602_v16  ;;  %v605_v24 = vld [vmem:[%s7264_s26 + $0x78] sm:$0xff]  ;;  %v5870_v25 = vpack.c.bf16 %v601_v22, %v600_v21  ;;  %v1242_v51 = vld [vmem:[%s7230_s6] sm:$0xff]  ;;  %v1243_v52 = vld [vmem:[%s7230_s6 + $0x8] sm:$0xff]  ;;  %s587_s30 = scalar_lea.vmem %s7267_s18, %s5027_s25 }
  0x23   : > { %v6385_v18 = vld [vmem:[%s583_s1] sm:$0xff]  ;;  %v5876_v26 = vpack.c.bf16 %v605_v24, %v604_v23  ;;  %v933_v48 = vld [vmem:[%s7228_s4 + $0x78] sm:$0xff]  ;;  %v5903_v53 = vpack.c.bf16 %v1243_v52, %v1242_v51  ;;  %v1244_v54 = vld [vmem:[%s7230_s6 + $0x10] sm:$0xff]  ;;  %s4951_s27 = sshll.u32 %s579_s21, 4  ;;  %s4938_s18 = scalar_lea.sflag [#allocation3], %s577_s19  ;;  %s7183_s27 = int_to_ptr.vmem [resolvable:$true] %s4951_s27 }
  0x24   : > { %5859 = vmatpush3.bf16.msra.mxu0 %v5858_v12  ;;  %v5900_v50 = vpack.c.bf16 %v933_v48, %v932_v47  ;;  %v1245_v55 = vld [vmem:[%s7230_s6 + $0x18] sm:$0xff]  ;;  %v1246_v57 = vld [vmem:[%s7230_s6 + $0x20] sm:$0xff]  ;;  %v1247_v58 = vld [vmem:[%s7230_s6 + $0x28] sm:$0xff]  ;;  %s6126_s29 = scalar_lea.vmem %s6125_s20, 256  ;;  %p6127_p0 = scmp.lt.s32.totalorder %s7183_s27, %s6125_s20 }
  0x25   : > { %5865 = vmatpush3.bf16.msra.mxu1 %v5864_v13  ;;  %5866 = vmatprep.subr.bf16.mxu0 %v6184_v3  ;;  %v5906_v56 = vpack.c.bf16 %v1245_v55, %v1244_v54  ;;  %v1250_v59 = vld [vmem:[%s7230_s6 + $0x40] sm:$0xff]  ;;  %v5909_v60 = vpack.c.bf16 %v1247_v58, %v1246_v57  ;;  %v1251_v61 = vld [vmem:[%s7230_s6 + $0x48] sm:$0xff]  ;;  %v1248_v63 = vld [vmem:[%s7230_s6 + $0x30] sm:$0xff] }
  0x26   : > { %5872 = vmatprep.subr.bf16.mxu1 %v6184_v3  ;;  %v5915_v62 = vpack.c.bf16 %v1251_v61, %v1250_v59  ;;  %v1249_v0 = vld [vmem:[%s7230_s6 + $0x38] sm:$0xff]  ;;  %v1252_v1 = vld [vmem:[%s7230_s6 + $0x50] sm:$0xff]  ;;  %v1254_v6 = vld [vmem:[%s7230_s6 + $0x60] sm:$0xff] }
  0x27   : > { %5419 = vmatmul.mubr.msk.f32.vlgmr.msra.gmra.mrb[0].mxu0 %vm634_vm1, %v6385_v18  ;;  %v5912_v2 = vpack.c.bf16 %v1249_v0, %v1248_v63  ;;  %v1253_v4 = vld [vmem:[%s7230_s6 + $0x58] sm:$0xff]  ;;  %v1255_v7 = vld [vmem:[%s7230_s6 + $0x68] sm:$0xff]  ;;  %v1256_v9 = vld [vmem:[%s7230_s6 + $0x70] sm:$0xff] }
  0x28   : > { %5430 = vmatmul.mubr.msk.f32.vlgmr.msra.gmra.mrb[0].mxu1 %vm634_vm1, %v6385_v18  ;;  %5868 = vmatpush3.bf16.msra.mxu0 %v5867_v19  ;;  %v5918_v5 = vpack.c.bf16 %v1253_v4, %v1252_v1  ;;  %v5921_v8 = vpack.c.bf16 %v1255_v7, %v1254_v6  ;;  %v1257_v10 = vld [vmem:[%s7230_s6 + $0x78] sm:$0xff]  ;;  %v5037_v22 = vld [vmem:[%s7229_s5] ss:$0 sm:$0xff]  ;;  %v5038_v24 = vld [vmem:[%s7229_s5 + $0x1] ss:$0 sm:$0xff] }
  0x29   : > { %5874 = vmatpush3.bf16.msra.mxu1 %v5873_v20  ;;  %5869 = vmatprep.subr.bf16.mxu0 %v6184_v3  ;;  %v5924_v12 = vpack.c.bf16 %v1257_v10, %v1256_v9  ;;  %v5039_v33 = vld [vmem:[%s7229_s5 + $0x2] ss:$0 sm:$0xff]  ;;  %v5040_v34 = vld [vmem:[%s7229_s5 + $0x3] ss:$0 sm:$0xff]  ;;  %v5045_v46 = vld [vmem:[%s7231_s7] ss:$0 sm:$0xff] }
  0x2a   : > { %5875 = vmatprep.subr.bf16.mxu1 %v6184_v3  ;;  %5440 = vmatprep.mubr.msk.f32.mxu0 %vm6185_vm0, %v6186_v11  ;;  %v5032_v41 = vld [vmem:[%s7266_s3 + $0x3] ss:$0 sm:$0xff] }
  0x2b   : > { %5451 = vmatprep.mubr.msk.f32.mxu1 %vm6185_vm0, %v6186_v11  ;;  %v6626_v58 = vld [vmem:[%s587_s30] sm:$0xff]  ;;  %s6120_s30 = scalar_lea.vmem %s7183_s27, 128 }
  0x2c   : > { %5871 = vmatpush3.bf16.msra.mxu0 %v5870_v25  ;;  %v5029_v25 = vld [vmem:[%s7266_s3] ss:$0 sm:$0xff]  ;;  %p6121_p11 = scmp.ne.s32.totalorder %s7183_s27, %s6120_s30  ;;  %p6128_p1 = scmp.lt.s32.totalorder %s6126_s29, %s6120_s30 }
  0x2d   : > { %5877 = vmatpush3.bf16.msra.mxu1 %v5876_v26  ;;  %5878 = vmatprep.subr.bf16.mxu0 %v6184_v3 }
  0x2e   : > { %5884 = vmatprep.subr.bf16.mxu1 %v6184_v3  ;;  %p6122_p12 = pnand %p6121_p11, %p6321_p5  ;;  %p6129_p2 = por %p6128_p1, %p6127_p0 }
  0x2f   : > { %5441 = vmatmul.mubr.msk.f32.vlgmr.msra.gmra.mrb[2].mxu0 %vm634_vm1, %v6385_v18 }
  0x30   : > { %5452 = vmatmul.mubr.msk.f32.vlgmr.msra.gmra.mrb[2].mxu1 %vm634_vm1, %v6385_v18  ;;  %5880 = vmatpush3.bf16.msra.mxu0 %v5879_v31  ;;  %p6123_p13 = pneg %p6122_p12 }
  0x31   : > { %5886 = vmatpush3.bf16.msra.mxu1 %v5885_v32  ;;  %5881 = vmatprep.subr.bf16.mxu0 %v6184_v3  ;;  %v5030_v32 = vld [vmem:[%s7266_s3 + $0x1] ss:$0 sm:$0xff] }
  0x32   : > { %5887 = vmatprep.subr.bf16.mxu1 %v6184_v3  ;;  %5462 = vmatprep.mubr.msk.f32.mxu0 %vm6185_vm0, %v6186_v11  ;;  %p6130_p3 = pnand %p6129_p2, %p6123_p13 }
  0x33   : > { %5473 = vmatprep.mubr.msk.f32.mxu1 %vm6185_vm0, %v6186_v11 }
  0x34   : > { %5883 = vmatpush3.bf16.msra.mxu0 %v5882_v37  ;;  %v5031_v37 = vld [vmem:[%s7266_s3 + $0x2] ss:$0 sm:$0xff] }
  0x35   : > { %5889 = vmatpush3.bf16.msra.mxu1 %v5888_v38  ;;  %5890 = vmatprep.subr.bf16.mxu0 %v6184_v3 }
  0x36   : > { %5896 = vmatprep.subr.bf16.mxu1 %v6184_v3 }
  0x37   : > { %5463 = vmatmul.mubr.msk.f32.vlgmr.msra.gmra.mrb[4].mxu0 %vm634_vm1, %v6385_v18 }
  0x38   : > { %5474 = vmatmul.mubr.msk.f32.vlgmr.msra.gmra.mrb[4].mxu1 %vm634_vm1, %v6385_v18  ;;  %5892 = vmatpush3.bf16.msra.mxu0 %v5891_v43 }
  0x39   : > { %5898 = vmatpush3.bf16.msra.mxu1 %v5897_v44  ;;  %5893 = vmatprep.subr.bf16.mxu0 %v6184_v3 }
  0x3a   : > { %5899 = vmatprep.subr.bf16.mxu1 %v6184_v3  ;;  %5484 = vmatprep.mubr.msk.f32.mxu0 %vm6185_vm0, %v6186_v11 }
  0x3b   : > { %5495 = vmatprep.mubr.msk.f32.mxu1 %vm6185_vm0, %v6186_v11 }
  0x3c   : > { %5895 = vmatpush3.bf16.msra.mxu0 %v5894_v49 }
  0x3d   : > { %5901 = vmatpush3.bf16.msra.mxu1 %v5900_v50  ;;  %5902 = vmatprep.subr.bf16.mxu0 %v6184_v3  ;;  %v5046_v50 = vld [vmem:[%s7231_s7 + $0x1] ss:$0 sm:$0xff] }
  0x3e   : > { %5908 = vmatprep.subr.bf16.mxu1 %v6184_v3 }
  0x3f   : > { %5485 = vmatmul.mubr.msk.f32.vlgmr.msra.gmra.mrb[6].mxu0 %vm634_vm1, %v6385_v18 }
  0x40   : > { %5496 = vmatmul.mubr.msk.f32.vlgmr.msra.gmra.mrb[6].mxu1 %vm634_vm1, %v6385_v18  ;;  %5904 = vmatpush3.bf16.msra.mxu0 %v5903_v53 }
  0x41   : > { %5905 = vmatprep.subr.bf16.mxu0 %v6184_v3  ;;  %5506 = vmatprep.mubr.msk.f32.mxu0 %vm6185_vm0, %v6186_v11 }
  0x42   : > { %5517 = vmatprep.mubr.msk.f32.mxu1 %vm6185_vm0, %v6186_v11  ;;  %5910 = vmatpush3.bf16.msra.mxu1 %v5909_v60 }
  0x43   : > { %5911 = vmatprep.subr.bf16.mxu1 %v6184_v3 }
  0x44   : > { %5907 = vmatpush3.bf16.msra.mxu0 %v5906_v56 }
  0x45   : > { %5914 = vmatprep.subr.bf16.mxu0 %v6184_v3 }
  0x46   : > { %5913 = vmatpush3.bf16.msra.mxu1 %v5912_v2 }
  0x47   : > { %5507 = vmatmul.mubr.msk.f32.vlgmr.msra.gmra.mrb[8].mxu0 %vm634_vm1, %v6385_v18  ;;  %5920 = vmatprep.subr.bf16.mxu1 %v6184_v3 }
  0x48   : > { %5916 = vmatpush3.bf16.msra.mxu0 %v5915_v62  ;;  %5528 = vmatprep.mubr.msk.f32.mxu0 %vm6185_vm0, %v6186_v11 }
  0x49   : > { %5917 = vmatprep.subr.bf16.mxu0 %v6184_v3  ;;  %5518 = vmatmul.mubr.msk.f32.vlgmr.msra.gmra.mrb[8].mxu1 %vm634_vm1, %v6385_v18 }
  0x4a   : > { %5922 = vmatpush3.bf16.msra.mxu1 %v5921_v8  ;;  %5539 = vmatprep.mubr.msk.f32.mxu1 %vm6185_vm0, %v6186_v11 }
  0x4b   : > { %5923 = vmatprep.subr.bf16.mxu1 %v6184_v3 }
  0x4c   : > { %5919 = vmatpush3.bf16.msra.mxu0 %v5918_v5 }
  0x4d   : > { %5542 = vmatprep.subr.mxu0 %v6186_v11 }
  0x4e   : > { %5925 = vmatpush3.bf16.msra.mxu1 %v5924_v12 }
  0x4f   : > { %5529 = vmatmul.mubr.msk.f32.vlgmr.msra.gmra.mrb[10].mxu0 %vm634_vm1, %v6385_v18  ;;  %5557 = vmatprep.subr.mxu1 %v6186_v11 }
  0x50   : > { %5544 = vmatprep.mubr.msk.f32.mxu0 %vm6185_vm0, %v6186_v11 }
  0x51   : > { %5540 = vmatmul.mubr.msk.f32.vlgmr.msra.gmra.mrb[10].mxu1 %vm634_vm1, %v6385_v18 }
  0x52   : > { %5559 = vmatprep.mubr.msk.f32.mxu1 %vm6185_vm0, %v6186_v11 }
  0xfa   : > { %v704_v13 = vpop.f32.mrb[0].mxu0 }
  0xfb   : > { %v5420_v14 = vpop.f32.mrb[1].mxu0  ;;  %v774_v15 = vpop.f32.mrb[0].mxu1  ;;  %v705_v31 = vadd.f32 %v5029_v25, %v704_v13 }
  0xfc   : > { %v5431_v16 = vpop.f32.mrb[1].mxu1  ;;  %v775_v35 = vadd.f32 %v5030_v32, %v774_v15 }
 0x102   : > { %v844_v17 = vpop.f32.mrb[2].mxu0 }
 0x103   : > { %v5442_v19 = vpop.f32.mrb[3].mxu0  ;;  %v914_v20 = vpop.f32.mrb[2].mxu1  ;;  %v845_v44 = vadd.f32 %v5031_v37, %v844_v17  ;;  %v5047_v37 = vld [vmem:[%s7231_s7 + $0x2] ss:$0 sm:$0xff] }
 0x104   : > { %v5453_v21 = vpop.f32.mrb[3].mxu1  ;;  %v915_v45 = vadd.f32 %v5032_v41, %v914_v20 }
 0x10a   : > { %v1028_v23 = vpop.f32.mrb[4].mxu0 }
 0x10b   : > { %v1029_v26 = vadd.f32 %v5037_v22, %v1028_v23  ;;  %v5464_v27 = vpop.f32.mrb[5].mxu0  ;;  %v1098_v28 = vpop.f32.mrb[4].mxu1 }
 0x10c   : > { %v5475_v29 = vpop.f32.mrb[5].mxu1  ;;  %v1099_v30 = vadd.f32 %v5038_v24, %v1098_v28 }
 0x10d   : > { %5543 = vmatpush3.xpose.msk.msra.mxu0 %vm1566_vm2, %v1029_v26 }
 0x10e   : > { %5547 = vmatprep.subr.mxu0 %v6186_v11 }
 0x110   : > { %5545 = vmatmul.mubr.msk.f32.vlgmr.msra.gmra.mrb[12].mxu0 %vm1566_vm2, %v705_v31 }
 0x111   : > { %5548 = vmatpush3.xpose.msk.msra.mxu0 %vm1566_vm2, %v1099_v30  ;;  %5549 = vmatprep.mubr.msk.f32.mxu0 %vm6185_vm0, %v6186_v11 }
 0x112   : > { %v1168_v36 = vpop.f32.mrb[6].mxu0  ;;  %5552 = vmatprep.subr.mxu0 %v6186_v11 }
 0x113   : > { %v1169_v38 = vadd.f32 %v5039_v33, %v1168_v36  ;;  %v1238_v39 = vpop.f32.mrb[6].mxu1  ;;  %v5486_v40 = vpop.f32.mrb[7].mxu0 }
 0x114   : > { %v1239_v42 = vadd.f32 %v5040_v34, %v1238_v39  ;;  %5550 = vmatmul.mubr.msk.f32.vlgmr.msra.gmra.mrb[14].mxu0 %vm1566_vm2, %v775_v35  ;;  %v5497_v43 = vpop.f32.mrb[7].mxu1 }
 0x115   : > { %5553 = vmatpush3.xpose.msk.msra.mxu0 %vm1566_vm2, %v1169_v38  ;;  %5554 = vmatprep.mubr.msk.f32.mxu0 %vm6185_vm0, %v6186_v11 }
 0x116   : > { %5558 = vmatpush3.xpose.msk.msra.mxu1 %vm1566_vm2, %v1239_v42  ;;  %5562 = vmatprep.subr.mxu0 %v6186_v11  ;;  %v5048_v42 = vld [vmem:[%s7231_s7 + $0x3] ss:$0 sm:$0xff] }
 0x117   : > { %5567 = vmatprep.subr.mxu1 %v6186_v11 }
 0x118   : > { %5555 = vmatmul.mubr.msk.f32.vlgmr.msra.gmra.mrb[16].mxu0 %vm1566_vm2, %v845_v44 }
 0x119   : > { %5560 = vmatmul.mubr.msk.f32.vlgmr.msra.gmra.mrb[12].mxu1 %vm1566_vm2, %v915_v45  ;;  %5564 = vmatprep.mubr.msk.f32.mxu0 %vm6185_vm0, %v6186_v11 }
 0x11a   : > { %5569 = vmatprep.mubr.msk.f32.mxu1 %vm6185_vm0, %v6186_v11  ;;  %v1352_v47 = vpop.f32.mrb[8].mxu0 }
 0x11b   : > { %v1353_v48 = vadd.f32 %v5045_v46, %v1352_v47  ;;  %v5508_v49 = vpop.f32.mrb[9].mxu0 }
 0x11c   : > { %v1422_v51 = vpop.f32.mrb[8].mxu1 }
 0x11d   : > { %5563 = vmatpush3.msra.mxu0 %v1353_v48  ;;  %v1423_v52 = vadd.f32 %v5046_v50, %v1422_v51  ;;  %v5519_v54 = vpop.f32.mrb[9].mxu1  ;;  %v2207_v50 = vld [vmem:[%s7232_s8] sm:$0xff]  ;;  %v2208_v51 = vld [vmem:[%s7232_s8 + $0x8] sm:$0xff] }
 0x11e   : > { %5572 = vmatprep.subr.mxu0 %v6186_v11 }
 0x11f   : > { %5568 = vmatpush3.msra.mxu1 %v1423_v52  ;;  %v2209_v52 = vld [vmem:[%s7232_s8 + $0x10] sm:$0xff] }
 0x120   : > { %5577 = vmatprep.subr.mxu1 %v6186_v11 }
 0x122   : > { %v6616_v53 = vpop.f32.mrb[10].mxu0 }
 0x123   : > { %v5530_v55 = vpop.f32.mrb[11].mxu0  ;;  %v1493_v41 = vadd.f32 %v5047_v37, %v6616_v53  ;;  %v5071_v37 = vld [vmem:[%s7235_s11] ss:$0 sm:$0xff] }
 0x124   : > { %v6619_v56 = vpop.f32.mrb[10].mxu1  ;;  %v2210_v55 = vld [vmem:[%s7232_s8 + $0x18] sm:$0xff] }
 0x125   : > { %v5541_v57 = vpop.f32.mrb[11].mxu1  ;;  %v1563_v45 = vadd.f32 %v5048_v42, %v6619_v56 }
 0x1e3   : > { %v1639_v59 = vpop.f32.mrb[12].mxu0 }
 0x1e4   : > { %v1640_v60 = vadd.f32 %v1639_v59, %v6626_v58  ;;  %v5546_v61 = vpop.f32.mrb[13].mxu0 }
 0x1e6   : > { %v1871_v62 = vsel %vm1566_vm2, %v1640_v60, -inf }
 0x1e7   : > { %1872 = vmax.xlane.f32.xlu0 %v1871_v62  ;;  %v1715_v63 = vpop.f32.mrb[14].mxu0 }
 0x1e8   : > { %v1716_v0 = vadd.f32 %v1715_v63, %v6626_v58  ;;  %v5551_v1 = vpop.f32.mrb[15].mxu0 }
 0x1ea   : > { %v1874_v2 = vsel %vm1566_vm2, %v1716_v0, -inf }
 0x1eb   : > { %1875 = vmax.xlane.f32.xlu0 %v1874_v2  ;;  %v1791_v4 = vpop.f32.mrb[16].mxu0 }
 0x1ec   : > { %v1867_v5 = vpop.f32.mrb[12].mxu1  ;;  %v1792_v6 = vadd.f32 %v1791_v4, %v6626_v58  ;;  %v5556_v7 = vpop.f32.mrb[17].mxu0 }
 0x1ed   : > { %v5561_v8 = vpop.f32.mrb[13].mxu1  ;;  %v1868_v9 = vadd.f32 %v1867_v5, %v6626_v58 }
 0x1ee   : > { %v1877_v10 = vsel %vm1566_vm2, %v1792_v6, -inf }
 0x1ef   : > { %1878 = vmax.xlane.f32.xlu1 %v1877_v10  ;;  %v1880_v12 = vsel %vm1566_vm2, %v1868_v9, -inf }
 0x1f3   : > { %1881 = vmax.xlane.f32.xlu1 %v1880_v12 }
 0x274   : > { %v1873_v13 = vpop.xlane.xlu0 %1872 }
 0x275   : > { %v1883_v14 = vsub.f32 %v1640_v60, %v1873_v13 }
 0x277   : > { %v1887_v15 = vmul.f32 1.442695, %v1883_v14  ;;  %v5069_v14 = vld [vmem:[%s7233_s9] ss:$0 sm:$0xff] }
 0x278   : > { %v1876_v16 = vpop.xlane.xlu0 %1875 }
 0x279   : > { %6076 = vpow2.f32 %v1887_v15  ;;  %v1884_v17 = vsub.f32 %v1716_v0, %v1876_v16 }
 0x27b   : > { %v1889_v19 = vmul.f32 1.442695, %v1884_v17 }
 0x27c   : > { %v1879_v20 = vpop.xlane.xlu1 %1878 }
 0x27d   : > { %6078 = vpow2.f32 %v1889_v19  ;;  %v1885_v21 = vsub.f32 %v1792_v6, %v1879_v20 }
 0x27f   : > { %v1891_v22 = vmul.f32 1.442695, %v1885_v21 }
 0x280   : > { %v1882_v23 = vpop.xlane.xlu1 %1881 }
 0x281   : > { %6080 = vpow2.f32 %v1891_v22  ;;  %v1886_v24 = vsub.f32 %v1868_v9, %v1882_v23 }
 0x283   : > { %v6077_v25 = vpop.eup %6076  ;;  %v1893_v26 = vmul.f32 1.442695, %v1886_v24 }
 0x284   : > { %v1895_v27 = vsel %vm1566_vm2, %v6077_v25, 0.0 }
 0x285   : > { %6082 = vpow2.f32 %v1893_v26  ;;  %1896 = vadd.xlane.f32.xlu0 %v1895_v27  ;;  %v2549_v26 = vld [vmem:[%s7236_s12] sm:$0xff]  ;;  %v2550_v27 = vld [vmem:[%s7236_s12 + $0x8] sm:$0xff] }
 0x287   : > { %v6079_v28 = vpop.eup %6078 }
 0x288   : > { %v1898_v29 = vsel %vm1566_vm2, %v6079_v28, 0.0 }
 0x289   : > { %1899 = vadd.xlane.f32.xlu1 %v1898_v29  ;;  %v2552_v29 = vld [vmem:[%s7236_s12 + $0x18] sm:$0xff] }
 0x28b   : > { %v6081_v30 = vpop.eup %6080 }
 0x28c   : > { %v1901_v31 = vsel %vm1566_vm2, %v6081_v30, 0.0 }
 0x28d   : > { %1902 = vadd.xlane.f32.xlu0 %v1901_v31 }
 0x28f   : > { %v6083_v32 = vpop.eup %6082 }
 0x290   : > { %v1904_v33 = vsel %vm1566_vm2, %v6083_v32, 0.0 }
 0x291   : > { %1905 = vadd.xlane.f32.xlu1 %v1904_v33 }
 0x312   : > { %v1897_v34 = vpop.xlane.xlu0 %1896 }
 0x313   : > { %6084 = vrcp.f32 %v1897_v34 }
 0x316   : > { %v1900_v35 = vpop.xlane.xlu1 %1899 }
 0x317   : > { %6086 = vrcp.f32 %v1900_v35  ;;  %v5070_v35 = vld [vmem:[%s7234_s10] ss:$0 sm:$0xff] }
 0x31a   : > { %v1903_v36 = vpop.xlane.xlu0 %1902 }
 0x31b   : > { %6088 = vrcp.f32 %v1903_v36 }
 0x31d   : > { %v6085_v38 = vpop.eup %6084 }
 0x31e   : > { %v1911_v39 = vmul.f32 %v6085_v38, %v6077_v25  ;;  %v1906_v40 = vpop.xlane.xlu1 %1905 }
 0x31f   : > { %6090 = vrcp.f32 %v1906_v40  ;;  %v2638_v40 = vld [vmem:[%s7238_s14] sm:$0xff] }
 0x320   : > { %5565 = vmatmul.mubr.msk.f32.vlgmr.msra.gmra.mrb[18].mxu0 %vm1566_vm2, %v1911_v39 }
 0x321   : > { %v6087_v43 = vpop.eup %6086  ;;  %5573 = vmatpush3.msra.mxu0 %v1493_v41  ;;  %5574 = vmatprep.mubr.msk.f32.mxu0 %vm6185_vm0, %v6186_v11  ;;  %v2639_v41 = vld [vmem:[%s7238_s14 + $0x8] sm:$0xff] }
 0x322   : > { %v1912_v44 = vmul.f32 %v6087_v43, %v6079_v28  ;;  %5582 = vmatprep.subr.mxu0 %v6186_v11  ;;  %v5927_v28 = vpack.c.bf16 %v2550_v27, %v2549_v26  ;;  %v5933_v42 = vpack.c.bf16 %v2639_v41, %v2638_v40  ;;  %v2640_v43 = vld [vmem:[%s7238_s14 + $0x10] sm:$0xff]  ;;  %v5109_v41 = vld [vmem:[%s7228_s4 + $0x98] sm:$0xff] }
 0x323   : > { %v5108_v40 = vld [vmem:[%s7228_s4 + $0x90] sm:$0xff] }
 0x324   : > { %5570 = vmatmul.mubr.msk.f32.vlgmr.msra.gmra.mrb[14].mxu1 %vm1566_vm2, %v1912_v44  ;;  %v2641_v44 = vld [vmem:[%s7238_s14 + $0x18] sm:$0xff] }
 0x325   : > { %v6089_v46 = vpop.eup %6088  ;;  %5578 = vmatpush3.msra.mxu1 %v1563_v45  ;;  %5579 = vmatprep.mubr.msk.f32.mxu1 %vm6185_vm0, %v6186_v11  ;;  %v5936_v45 = vpack.c.bf16 %v2641_v44, %v2640_v43  ;;  %v5972_v43 = vpack.c.bf16 %v5109_v41, %v5108_v40  ;;  %v5090_v44 = vld [vmem:[%s7264_s26 + $0xe0] sm:$0xff] }
 0x326   : > { %v1913_v47 = vmul.f32 %v6089_v46, %v6081_v30  ;;  %5587 = vmatprep.subr.mxu1 %v6186_v11  ;;  %v2642_v46 = vld [vmem:[%s7238_s14 + $0x20] sm:$0xff] }
 0x328   : > { %5575 = vmatmul.mubr.msk.f32.vlgmr.msra.gmra.mrb[20].mxu0 %vm1566_vm2, %v1913_v47  ;;  %v2643_v47 = vld [vmem:[%s7238_s14 + $0x28] sm:$0xff] }
 0x329   : > { %v6091_v48 = vpop.eup %6090  ;;  %5584 = vmatprep.mubr.msk.f32.mxu0 %vm6185_vm0, %v6186_v11  ;;  %5583 = vmatpush3.msra.mxu0 %v2207_v50  ;;  %v2645_v50 = vld [vmem:[%s7238_s14 + $0x38] sm:$0xff] }
 0x32a   : > { %v1914_v49 = vmul.f32 %v6091_v48, %v6083_v32  ;;  %5592 = vmatprep.subr.mxu0 %v6186_v11  ;;  %v5939_v48 = vpack.c.bf16 %v2643_v47, %v2642_v46  ;;  %v5114_v46 = vld [vmem:[%s7228_s4 + $0xc0] sm:$0xff]  ;;  %v5115_v47 = vld [vmem:[%s7228_s4 + $0xc8] sm:$0xff] }
 0x32c   : > { %5580 = vmatmul.mubr.msk.f32.vlgmr.msra.gmra.mrb[16].mxu1 %vm1566_vm2, %v1914_v49  ;;  %v2644_v49 = vld [vmem:[%s7238_s14 + $0x30] sm:$0xff] }
 0x32d   : > { %5589 = vmatprep.mubr.msk.f32.mxu1 %vm6185_vm0, %v6186_v11  ;;  %5588 = vmatpush3.msra.mxu1 %v2208_v51  ;;  %v5942_v51 = vpack.c.bf16 %v2645_v50, %v2644_v49  ;;  %v5981_v49 = vpack.c.bf16 %v5115_v47, %v5114_v46  ;;  %v5092_v50 = vld [vmem:[%s7264_s26 + $0xf0] sm:$0xff]  ;;  %v5100_v47 = vld [vmem:[%s7266_s3 + $0x6] ss:$0 sm:$0xff] }
 0x32e   : > { %5597 = vmatprep.subr.mxu1 %v6186_v11 }
 0x3f3   : > { %v1984_v53 = vpop.f32.mrb[18].mxu0 }
 0x3f4   : > { %v5566_v54 = vpop.f32.mrb[19].mxu0  ;;  %5585 = vmatmul.mubr.msk.f32.vlgmr.msra.gmra.mrb[22].mxu0 %vm1566_vm2, %v1984_v53 }
 0x3f5   : > { %5593 = vmatpush3.msra.mxu0 %v2209_v52  ;;  %5594 = vmatprep.mubr.msk.f32.mxu0 %vm6185_vm0, %v6186_v11  ;;  %v5072_v52 = vld [vmem:[%s7237_s13] ss:$0 sm:$0xff] }
 0x3f6   : > { %5926 = vmatprep.subr.bf16.mxu0 %v6184_v3 }
 0x3f7   : > { %v2057_v56 = vpop.f32.mrb[14].mxu1 }
 0x3f8   : > { %v5571_v57 = vpop.f32.mrb[15].mxu1  ;;  %5590 = vmatmul.mubr.msk.f32.vlgmr.msra.gmra.mrb[18].mxu1 %vm1566_vm2, %v2057_v56 }
 0x3f9   : > { %5598 = vmatpush3.msra.mxu1 %v2210_v55  ;;  %5599 = vmatprep.mubr.msk.f32.mxu1 %vm6185_vm0, %v6186_v11 }
 0x3fa   : > { %5932 = vmatprep.subr.bf16.mxu1 %v6184_v3 }
 0x3fb   : > { %v2130_v59 = vpop.f32.mrb[20].mxu0 }
 0x3fc   : > { %v5576_v60 = vpop.f32.mrb[21].mxu0  ;;  %5595 = vmatmul.mubr.msk.f32.vlgmr.msra.gmra.mrb[24].mxu0 %vm1566_vm2, %v2130_v59 }
 0x3fd   : > { %5610 = vmatprep.mubr.msk.f32.mxu0 %vm6185_vm0, %v6186_v11  ;;  %5928 = vmatpush3.bf16.msra.mxu0 %v5927_v28  ;;  %v5076_v28 = vld [vmem:[%s7240_s16] ss:$0 sm:$0xff] }
 0x3fe   : > { %5929 = vmatprep.subr.bf16.mxu0 %v6184_v3 }
 0x3ff   : > { %v2203_v61 = vpop.f32.mrb[16].mxu1 }
 0x400   : > { %v5581_v62 = vpop.f32.mrb[17].mxu1  ;;  %5600 = vmatmul.mubr.msk.f32.vlgmr.msra.gmra.mrb[20].mxu1 %vm1566_vm2, %v2203_v61 }
 0x401   : > { %5629 = vmatprep.mubr.msk.f32.mxu1 %vm6185_vm0, %v6186_v11  ;;  %5934 = vmatpush3.bf16.msra.mxu1 %v5933_v42  ;;  %v5074_v62 = vld [vmem:[%s7239_s15] ss:$0 sm:$0xff] }
 0x402   : > { %5935 = vmatprep.subr.bf16.mxu1 %v6184_v3 }
 0x405   : > { %5937 = vmatpush3.bf16.msra.mxu1 %v5936_v45  ;;  %v5091_v45 = vld [vmem:[%s7264_s26 + $0xe8] sm:$0xff] }
 0x406   : > { %5938 = vmatprep.subr.bf16.mxu1 %v6184_v3 }
 0x409   : > { %5940 = vmatpush3.bf16.msra.mxu1 %v5939_v48  ;;  %v5963_v48 = vpack.c.bf16 %v5091_v45, %v5090_v44  ;;  %v5128_v44 = vld [vmem:[%s7229_s5 + $0x6] ss:$0 sm:$0xff] }
 0x40a   : > { %5941 = vmatprep.subr.bf16.mxu1 %v6184_v3 }
 0x40d   : > { %5943 = vmatpush3.bf16.msra.mxu1 %v5942_v51  ;;  %v5093_v51 = vld [vmem:[%s7264_s26 + $0xf8] sm:$0xff] }
 0x40e   : > { %5956 = vmatprep.subr.bf16.mxu1 %v6184_v3 }
 0x4c7   : > { %v2280_v63 = vpop.f32.mrb[22].mxu0 }
 0x4c8   : > { %v5586_v0 = vpop.f32.mrb[23].mxu0  ;;  %v2503_v2 = vsel %vm634_vm1, %v2280_v63, 0.0 }
 0x4cb   : > { %v2353_v1 = vpop.f32.mrb[18].mxu1 }
 0x4cc   : > { %v2504_v4 = vsel %vm634_vm1, %v2353_v1, 0.0  ;;  %v5591_v5 = vpop.f32.mrb[19].mxu1 }
 0x4cd   : > { %v2505_v6 = vadd.f32 %v2504_v4, %v2503_v2 }
 0x4cf   : > { %v2426_v7 = vpop.f32.mrb[24].mxu0 }
 0x4d0   : > { %v2506_v8 = vsel %vm634_vm1, %v2426_v7, 0.0  ;;  %v5596_v9 = vpop.f32.mrb[25].mxu0 }
 0x4d1   : > { %v2507_v10 = vadd.f32 %v2506_v8, %v2505_v6 }
 0x4d3   : > { %v2499_v12 = vpop.f32.mrb[20].mxu1 }
 0x4d4   : > { %v2508_v13 = vsel %vm634_vm1, %v2499_v12, 0.0  ;;  %v5601_v15 = vpop.f32.mrb[21].mxu1  ;;  %v5079_v12 = vld [vmem:[%s7264_s26 + $0x88] sm:$0xff] }
 0x4d5   : > { %v2509_v16 = vadd.f32 %v2508_v13, %v2507_v10  ;;  %v5078_v10 = vld [vmem:[%s7264_s26 + $0x80] sm:$0xff]  ;;  %v5087_v15 = vld [vmem:[%s7264_s26 + $0xc8] sm:$0xff] }
 0x4d6   : > { %v5086_v13 = vld [vmem:[%s7264_s26 + $0xc0] sm:$0xff] }
 0x4d7   : > { %v2517_v17 = vadd.f32 %v5069_v14, %v2509_v16  ;;  %v5945_v14 = vpack.c.bf16 %v5079_v12, %v5078_v10  ;;  %v5957_v16 = vpack.c.bf16 %v5087_v15, %v5086_v13  ;;  %v5120_v13 = vld [vmem:[%s7228_s4 + $0xf0] sm:$0xff] }
 0x4d8   : > { %v5144_v15 = vld [vmem:[%s7230_s6 + $0xd0] sm:$0xff] }
 0x4d9   : > { %v2518_v19 = vadd.f32 %v2517_v17, %v6385_v18  ;;  %v2551_v18 = vld [vmem:[%s7236_s12 + $0x10] sm:$0xff] }
 0x4da   : > { %v5930_v30 = vpack.c.bf16 %v2552_v29, %v2551_v18  ;;  %v5080_v17 = vld [vmem:[%s7264_s26 + $0x90] sm:$0xff]  ;;  %v5082_v18 = vld [vmem:[%s7264_s26 + $0xa0] sm:$0xff] }
 0x4db   : > { %v2521_v20 = vsel %vm634_vm1, %v2518_v19, 0.0 }
 0x4dc   : > { %2522 = vadd.xlane.f32.xlu0 %v2521_v20  ;;  %5931 = vmatpush3.bf16.msra.mxu0 %v5930_v30  ;;  %v5088_v20 = vld [vmem:[%s7264_s26 + $0xd0] sm:$0xff]  ;;  %v5083_v30 = vld [vmem:[%s7264_s26 + $0xa8] sm:$0xff] }
 0x4dd   : > { %5944 = vmatprep.subr.bf16.mxu0 %v6184_v3 }
 0x569   : > { %v2523_v21 = vpop.xlane.xlu0 %2522 }
 0x56a   : > { %v2525_v22 = vmul.f32 0.03125, %v2523_v21 }
 0x56c   : > { %v2526_v23 = vsub.f32 %v2518_v19, %v2525_v22  ;;  %v5081_v19 = vld [vmem:[%s7264_s26 + $0x98] sm:$0xff] }
 0x56d   : > { %v5948_v21 = vpack.c.bf16 %v5081_v19, %v5080_v17  ;;  %v5089_v22 = vld [vmem:[%s7264_s26 + $0xd8] sm:$0xff] }
 0x56e   : > { %v2527_v24 = vmul.f32 %v2526_v23, %v2526_v23 }
 0x570   : > { %v2528_v25 = vsel %vm634_vm1, %v2527_v24, 0.0 }
 0x571   : > { %2529 = vadd.xlane.f32.xlu1 %v2528_v25 }
 0x5fe   : > { %v2530_v31 = vpop.xlane.xlu1 %2529 }
 0x5ff   : > { %v2531_v32 = vmul.f32 0.03125, %v2530_v31  ;;  %v5106_v31 = vld [vmem:[%s7228_s4 + $0x80] sm:$0xff] }
 0x601   : > { %v2532_v33 = vadd.f32 1e-12, %v2531_v32  ;;  %v5107_v32 = vld [vmem:[%s7228_s4 + $0x88] sm:$0xff] }
 0x603   : > { %6092 = vrsqrt.f32 %v2532_v33  ;;  %v5077_v33 = vld [vmem:[%s7241_s17] ss:$0 sm:$0xff] }
 0x60d   : > { %v6093_v34 = vpop.eup %6092 }
 0x60e   : > { %v2534_v36 = vmul.f32 %v6093_v34, %v2526_v23  ;;  %v5960_v23 = vpack.c.bf16 %v5089_v22, %v5088_v20  ;;  %v5138_v20 = vld [vmem:[%s7230_s6 + $0xa0] sm:$0xff] }
 0x610   : > { %v2541_v38 = vmul.f32 %v5070_v35, %v2534_v36  ;;  %v5951_v35 = vpack.c.bf16 %v5083_v30, %v5082_v18  ;;  %v5969_v36 = vpack.c.bf16 %v5107_v32, %v5106_v31  ;;  %v5148_v18 = vld [vmem:[%s7230_s6 + $0xf0] sm:$0xff] }
 0x612   : > { %v2548_v39 = vadd.f32 %v5071_v37, %v2541_v38  ;;  %v5084_v37 = vld [vmem:[%s7264_s26 + $0xb0] sm:$0xff] }
 0x614   : > { %5611 = vmatmul.mubr.msk.f32.vlgmr.msra.gmra.mrb[26].mxu0 %vm634_vm1, %v2548_v39 }
 0x615   : > { %5640 = vmatprep.mubr.msk.f32.mxu0 %vm6185_vm0, %v6186_v11  ;;  %5946 = vmatpush3.bf16.msra.mxu0 %v5945_v14  ;;  %v5121_v14 = vld [vmem:[%s7228_s4 + $0xf8] sm:$0xff] }
 0x616   : > { %5947 = vmatprep.subr.bf16.mxu0 %v6184_v3  ;;  %v5990_v17 = vpack.c.bf16 %v5121_v14, %v5120_v13 }
 0x619   : > { %5949 = vmatpush3.bf16.msra.mxu0 %v5948_v21  ;;  %v5139_v21 = vld [vmem:[%s7230_s6 + $0xa8] sm:$0xff] }
 0x61a   : > { %5950 = vmatprep.subr.bf16.mxu0 %v6184_v3  ;;  %v5999_v22 = vpack.c.bf16 %v5139_v21, %v5138_v20 }
 0x6e7   : > { %v2629_v53 = vpop.f32.mrb[26].mxu0 }
 0x6e8   : > { %v2630_v54 = vadd.f32 %v5072_v52, %v2629_v53  ;;  %v5612_v55 = vpop.f32.mrb[27].mxu0  ;;  %v5116_v52 = vld [vmem:[%s7228_s4 + $0xd0] sm:$0xff]  ;;  %v5117_v53 = vld [vmem:[%s7228_s4 + $0xd8] sm:$0xff] }
 0x6e9   : > { %v5984_v55 = vpack.c.bf16 %v5117_v53, %v5116_v52  ;;  %v5127_v52 = vld [vmem:[%s7229_s5 + $0x5] ss:$0 sm:$0xff]  ;;  %v5154_v53 = vld [vmem:[%s7231_s7 + $0x4] ss:$0 sm:$0xff] }
 0x6ea   : > { %v2634_v56 = vmul.f32 0.70710677, %v2630_v54  ;;  %v2633_v59 = vmul.f32 0.5, %v2630_v54  ;;  %v5966_v54 = vpack.c.bf16 %v5093_v51, %v5092_v50 }
 0x6ec   : > { %6094 = verf.f32 %v2634_v56  ;;  %v5110_v56 = vld [vmem:[%s7228_s4 + $0xa0] sm:$0xff] }
 0x6f6   : > { %v6095_v57 = vpop.eup %6094 }
 0x6f7   : > { %v2636_v60 = vadd.f32 1.0, %v6095_v57  ;;  %v5111_v57 = vld [vmem:[%s7228_s4 + $0xa8] sm:$0xff] }
 0x6f9   : > { %v2637_v61 = vmul.f32 %v2636_v60, %v2633_v59  ;;  %v5134_v59 = vld [vmem:[%s7230_s6 + $0x80] sm:$0xff]  ;;  %v5135_v60 = vld [vmem:[%s7230_s6 + $0x88] sm:$0xff] }
 0x6fb   : > { %5630 = vmatmul.mubr.msk.f32.vlgmr.msra.gmra.mrb[22].mxu1 %vm2653_vm3, %v2637_v61  ;;  %v5975_v61 = vpack.c.bf16 %v5111_v57, %v5110_v56  ;;  %v5099_v56 = vld [vmem:[%s7266_s3 + $0x5] ss:$0 sm:$0xff] }
 0x6fc   : > { %5662 = vmatprep.mubr.msk.f32.mxu1 %vm6185_vm0, %v6186_v11  ;;  %5958 = vmatpush3.bf16.msra.mxu1 %v5957_v16  ;;  %v5145_v16 = vld [vmem:[%s7230_s6 + $0xd8] sm:$0xff] }
 0x6fd   : > { %5959 = vmatprep.subr.bf16.mxu1 %v6184_v3  ;;  %v6008_v19 = vpack.c.bf16 %v5145_v16, %v5144_v15 }
 0x700   : > { %5961 = vmatpush3.bf16.msra.mxu1 %v5960_v23  ;;  %v5140_v23 = vld [vmem:[%s7230_s6 + $0xb0] sm:$0xff] }
 0x701   : > { %5968 = vmatprep.subr.bf16.mxu1 %v6184_v3 }
 0x7ce   : > { %v2723_v63 = vpop.f32.mrb[22].mxu1 }
 0x7cf   : > { %v2724_v0 = vadd.f32 %v5074_v62, %v2723_v63  ;;  %v5631_v1 = vpop.f32.mrb[23].mxu1  ;;  %v5993_v62 = vpack.c.bf16 %v5135_v60, %v5134_v59  ;;  %v5112_v63 = vld [vmem:[%s7228_s4 + $0xb0] sm:$0xff] }
 0x7d0   : > { %v5136_v1 = vld [vmem:[%s7230_s6 + $0x90] sm:$0xff] }
 0x7d1   : > { %v2727_v2 = vadd.f32 %v2724_v0, %v2548_v39  ;;  %v5085_v39 = vld [vmem:[%s7264_s26 + $0xb8] sm:$0xff] }
 0x7d2   : > { %v5954_v42 = vpack.c.bf16 %v5085_v39, %v5084_v37  ;;  %v5113_v0 = vld [vmem:[%s7228_s4 + $0xb8] sm:$0xff]  ;;  %v5098_v39 = vld [vmem:[%s7266_s3 + $0x4] ss:$0 sm:$0xff] }
 0x7d3   : > { %v2730_v4 = vsel %vm634_vm1, %v2727_v2, 0.0 }
 0x7d4   : > { %2731 = vadd.xlane.f32.xlu0 %v2730_v4  ;;  %v5978_v4 = vpack.c.bf16 %v5113_v0, %v5112_v63  ;;  %v5129_v63 = vld [vmem:[%s7229_s5 + $0x7] ss:$0 sm:$0xff] }
 0x861   : > { %v2732_v5 = vpop.xlane.xlu0 %2731 }
 0x862   : > { %v2733_v6 = vmul.f32 0.03125, %v2732_v5 }
 0x864   : > { %v2734_v7 = vsub.f32 %v2727_v2, %v2733_v6  ;;  %v5137_v2 = vld [vmem:[%s7230_s6 + $0x98] sm:$0xff]  ;;  %v5118_v6 = vld [vmem:[%s7228_s4 + $0xe0] sm:$0xff] }
 0x865   : > { %v5996_v5 = vpack.c.bf16 %v5137_v2, %v5136_v1  ;;  %v5101_v2 = vld [vmem:[%s7266_s3 + $0x7] ss:$0 sm:$0xff]  ;;  %s7181_s3 = scalar_lea.hbm %s7268_s24, %s5211_s22 }
 0x866   : > { %v2735_v8 = vmul.f32 %v2734_v7, %v2734_v7 }
 0x868   : > { %v2736_v9 = vsel %vm634_vm1, %v2735_v8, 0.0  ;;  %v5142_v8 = vld [vmem:[%s7230_s6 + $0xc0] sm:$0xff] }
 0x869   : > { %2737 = vadd.xlane.f32.xlu1 %v2736_v9  ;;  %v5143_v9 = vld [vmem:[%s7230_s6 + $0xc8] sm:$0xff] }
 0x86a   : > { %v6005_v12 = vpack.c.bf16 %v5143_v9, %v5142_v8  ;;  %v5155_v8 = vld [vmem:[%s7231_s7 + $0x5] ss:$0 sm:$0xff] }
 0x8f6   : > { %v2738_v24 = vpop.xlane.xlu1 %2737 }
 0x8f7   : > { %v2739_v25 = vmul.f32 0.03125, %v2738_v24  ;;  %v5141_v24 = vld [vmem:[%s7230_s6 + $0xb8] sm:$0xff] }
 0x8f9   : > { %v2740_v26 = vadd.f32 1e-12, %v2739_v25  ;;  %v6002_v25 = vpack.c.bf16 %v5141_v24, %v5140_v23 }
 0x8fb   : > { %6096 = vrsqrt.f32 %v2740_v26  ;;  %v5146_v26 = vld [vmem:[%s7230_s6 + $0xe0] sm:$0xff] }
 0x905   : > { %v6097_v27 = vpop.eup %6096 }
 0x906   : > { %v2742_v29 = vmul.f32 %v6097_v27, %v2734_v7  ;;  %v5119_v7 = vld [vmem:[%s7228_s4 + $0xe8] sm:$0xff] }
 0x907   : > { %v5987_v10 = vpack.c.bf16 %v5119_v7, %v5118_v6  ;;  %v5147_v27 = vld [vmem:[%s7230_s6 + $0xe8] sm:$0xff] }
 0x908   : > { %v2749_v34 = vmul.f32 %v5076_v28, %v2742_v29  ;;  %v6011_v28 = vpack.c.bf16 %v5147_v27, %v5146_v26  ;;  %v5149_v29 = vld [vmem:[%s7230_s6 + $0xf8] sm:$0xff] }
 0x909   : > { %v6014_v30 = vpack.c.bf16 %v5149_v29, %v5148_v18 }
 0x90a   : > { %v6811_v38 = vadd.f32 %v5077_v33, %v2749_v34 }
 0x90c   : > { %5641 = vmatmul.mubr.msk.f32.vlgmr.msra.gmra.mrb[28].mxu0 %vm634_vm1, %v6811_v38  ;;  %5663 = vmatmul.mubr.msk.f32.vlgmr.msra.gmra.mrb[24].mxu1 %vm634_vm1, %v6811_v38 }
 0x90d   : > { %5952 = vmatpush3.bf16.msra.mxu0 %v5951_v35  ;;  %5970 = vmatpush3.bf16.msra.mxu1 %v5969_v36  ;;  %v5126_v35 = vld [vmem:[%s7229_s5 + $0x4] ss:$0 sm:$0xff] }
 0x90e   : > { %5953 = vmatprep.subr.bf16.mxu0 %v6184_v3  ;;  %5971 = vmatprep.subr.bf16.mxu1 %v6184_v3 }
 0x90f   : > { %5651 = vmatprep.mubr.msk.f32.mxu0 %vm6185_vm0, %v6186_v11  ;;  %5684 = vmatprep.mubr.msk.f32.mxu1 %vm6185_vm0, %v6186_v11 }
 0x911   : > { %5955 = vmatpush3.bf16.msra.mxu0 %v5954_v42  ;;  %5973 = vmatpush3.bf16.msra.mxu1 %v5972_v43 }
 0x912   : > { %5962 = vmatprep.subr.bf16.mxu0 %v6184_v3  ;;  %5980 = vmatprep.subr.bf16.mxu1 %v6184_v3 }
 0x914   : > { %5652 = vmatmul.mubr.msk.f32.vlgmr.msra.gmra.mrb[30].mxu0 %vm634_vm1, %v6811_v38  ;;  %5685 = vmatmul.mubr.msk.f32.vlgmr.msra.gmra.mrb[26].mxu1 %vm634_vm1, %v6811_v38 }
 0x915   : > { %5964 = vmatpush3.bf16.msra.mxu0 %v5963_v48  ;;  %5982 = vmatpush3.bf16.msra.mxu1 %v5981_v49 }
 0x916   : > { %5965 = vmatprep.subr.bf16.mxu0 %v6184_v3  ;;  %5983 = vmatprep.subr.bf16.mxu1 %v6184_v3 }
 0x917   : > { %5673 = vmatprep.mubr.msk.f32.mxu0 %vm6185_vm0, %v6186_v11  ;;  %5706 = vmatprep.mubr.msk.f32.mxu1 %vm6185_vm0, %v6186_v11 }
 0x919   : > { %5967 = vmatpush3.bf16.msra.mxu0 %v5966_v54  ;;  %5985 = vmatpush3.bf16.msra.mxu1 %v5984_v55 }
 0x91a   : > { %5974 = vmatprep.subr.bf16.mxu0 %v6184_v3  ;;  %5992 = vmatprep.subr.bf16.mxu1 %v6184_v3 }
 0x91c   : > { %5674 = vmatmul.mubr.msk.f32.vlgmr.msra.gmra.mrb[32].mxu0 %vm634_vm1, %v6811_v38  ;;  %5707 = vmatmul.mubr.msk.f32.vlgmr.msra.gmra.mrb[28].mxu1 %vm634_vm1, %v6811_v38 }
 0x91d   : > { %5976 = vmatpush3.bf16.msra.mxu0 %v5975_v61  ;;  %5994 = vmatpush3.bf16.msra.mxu1 %v5993_v62 }
 0x91e   : > { %5977 = vmatprep.subr.bf16.mxu0 %v6184_v3  ;;  %5995 = vmatprep.subr.bf16.mxu1 %v6184_v3 }
 0x91f   : > { %5695 = vmatprep.mubr.msk.f32.mxu0 %vm6185_vm0, %v6186_v11  ;;  %5728 = vmatprep.mubr.msk.f32.mxu1 %vm6185_vm0, %v6186_v11 }
 0x921   : > { %5979 = vmatpush3.bf16.msra.mxu0 %v5978_v4  ;;  %5997 = vmatpush3.bf16.msra.mxu1 %v5996_v5 }
 0x922   : > { %5986 = vmatprep.subr.bf16.mxu0 %v6184_v3  ;;  %6004 = vmatprep.subr.bf16.mxu1 %v6184_v3 }
 0x924   : > { %5696 = vmatmul.mubr.msk.f32.vlgmr.msra.gmra.mrb[34].mxu0 %vm634_vm1, %v6811_v38  ;;  %5729 = vmatmul.mubr.msk.f32.vlgmr.msra.gmra.mrb[30].mxu1 %vm634_vm1, %v6811_v38 }
 0x925   : > { %5988 = vmatpush3.bf16.msra.mxu0 %v5987_v10  ;;  %6006 = vmatpush3.bf16.msra.mxu1 %v6005_v12 }
 0x926   : > { %5989 = vmatprep.subr.bf16.mxu0 %v6184_v3  ;;  %6007 = vmatprep.subr.bf16.mxu1 %v6184_v3 }
 0x927   : > { %5717 = vmatprep.mubr.msk.f32.mxu0 %vm6185_vm0, %v6186_v11  ;;  %5750 = vmatprep.mubr.msk.f32.mxu1 %vm6185_vm0, %v6186_v11 }
 0x929   : > { %5991 = vmatpush3.bf16.msra.mxu0 %v5990_v17  ;;  %6009 = vmatpush3.bf16.msra.mxu1 %v6008_v19 }
 0x92a   : > { %5998 = vmatprep.subr.bf16.mxu0 %v6184_v3  ;;  %5764 = vmatprep.subr.mxu1 %v6186_v11 }
 0x92c   : > { %5718 = vmatmul.mubr.msk.f32.vlgmr.msra.gmra.mrb[36].mxu0 %vm634_vm1, %v6811_v38  ;;  %5751 = vmatmul.mubr.msk.f32.vlgmr.msra.gmra.mrb[32].mxu1 %vm634_vm1, %v6811_v38 }
 0x92d   : > { %6000 = vmatpush3.bf16.msra.mxu0 %v5999_v22  ;;  %5739 = vmatprep.mubr.msk.f32.mxu0 %vm6185_vm0, %v6186_v11 }
 0x92e   : > { %6001 = vmatprep.subr.bf16.mxu0 %v6184_v3  ;;  %5766 = vmatprep.mubr.msk.f32.mxu1 %vm6185_vm0, %v6186_v11 }
 0x931   : > { %6003 = vmatpush3.bf16.msra.mxu0 %v6002_v25 }
 0x932   : > { %6010 = vmatprep.subr.bf16.mxu0 %v6184_v3 }
 0x934   : > { %5740 = vmatmul.mubr.msk.f32.vlgmr.msra.gmra.mrb[38].mxu0 %vm634_vm1, %v6811_v38 }
 0x935   : > { %6012 = vmatpush3.bf16.msra.mxu0 %v6011_v28  ;;  %5761 = vmatprep.mubr.msk.f32.mxu0 %vm6185_vm0, %v6186_v11 }
 0x936   : > { %6013 = vmatprep.subr.bf16.mxu0 %v6184_v3 }
 0x939   : > { %6015 = vmatpush3.bf16.msra.mxu0 %v6014_v30 }
 0x93a   : > { %5774 = vmatprep.subr.mxu0 %v6186_v11 }
 0x93c   : > { %5762 = vmatmul.mubr.msk.f32.vlgmr.msra.gmra.mrb[40].mxu0 %vm634_vm1, %v6811_v38 }
 0x93d   : > { %5776 = vmatprep.mubr.msk.f32.mxu0 %vm6185_vm0, %v6186_v11 }
 0x9df   : > { %v2872_v31 = vpop.f32.mrb[28].mxu0  ;;  %v3012_v32 = vpop.f32.mrb[24].mxu1 }
 0x9e0   : > { %v5642_v33 = vpop.f32.mrb[29].mxu0  ;;  %v5664_v34 = vpop.f32.mrb[25].mxu1  ;;  %v2873_v43 = vadd.f32 %v5098_v39, %v2872_v31  ;;  %v3013_v51 = vadd.f32 %v5100_v47, %v3012_v32 }
 0x9e7   : > { %v2942_v36 = vpop.f32.mrb[30].mxu0  ;;  %v3198_v37 = vpop.f32.mrb[26].mxu1 }
 0x9e8   : > { %v3199_v40 = vadd.f32 %v5126_v35, %v3198_v37  ;;  %v5653_v41 = vpop.f32.mrb[31].mxu0  ;;  %v5686_v42 = vpop.f32.mrb[27].mxu1  ;;  %v2943_v62 = vadd.f32 %v5099_v56, %v2942_v36 }
 0x9ea   : > { %5765 = vmatpush3.xpose.msk.msra.mxu1 %vm1566_vm2, %v3199_v40 }
 0x9eb   : > { %5769 = vmatprep.subr.mxu1 %v6186_v11 }
 0x9ed   : > { %5767 = vmatmul.mubr.msk.f32.vlgmr.msra.gmra.mrb[34].mxu1 %vm1566_vm2, %v2873_v43 }
 0x9ee   : > { %5771 = vmatprep.mubr.msk.f32.mxu1 %vm6185_vm0, %v6186_v11 }
 0x9ef   : > { %v3082_v45 = vpop.f32.mrb[32].mxu0  ;;  %v3338_v46 = vpop.f32.mrb[28].mxu1 }
 0x9f0   : > { %v3339_v48 = vadd.f32 %v5128_v44, %v3338_v46  ;;  %v5675_v49 = vpop.f32.mrb[33].mxu0  ;;  %v5708_v50 = vpop.f32.mrb[29].mxu1  ;;  %v3083_v7 = vadd.f32 %v5101_v2, %v3082_v45 }
 0x9f2   : > { %5775 = vmatpush3.xpose.msk.msra.mxu0 %vm1566_vm2, %v3339_v48 }
 0x9f3   : > { %5784 = vmatprep.subr.mxu0 %v6186_v11 }
 0x9f5   : > { %5777 = vmatmul.mubr.msk.f32.vlgmr.msra.gmra.mrb[42].mxu0 %vm1566_vm2, %v3013_v51 }
 0x9f6   : > { %5786 = vmatprep.mubr.msk.f32.mxu0 %vm6185_vm0, %v6186_v11 }
 0x9f7   : > { %v3268_v54 = vpop.f32.mrb[34].mxu0  ;;  %v3524_v55 = vpop.f32.mrb[30].mxu1 }
 0x9f8   : > { %v3269_v57 = vadd.f32 %v5127_v52, %v3268_v54  ;;  %v3525_v59 = vadd.f32 %v5154_v53, %v3524_v55  ;;  %v5697_v60 = vpop.f32.mrb[35].mxu0  ;;  %v5730_v61 = vpop.f32.mrb[31].mxu1  ;;  %v5156_v53 = vld [vmem:[%s7231_s7 + $0x6] ss:$0 sm:$0xff] }
 0x9fa   : > { %5770 = vmatpush3.xpose.msk.msra.mxu1 %vm1566_vm2, %v3269_v57  ;;  %5785 = vmatpush3.msra.mxu0 %v3525_v59 }
 0x9fb   : > { %5779 = vmatprep.subr.mxu1 %v6186_v11  ;;  %5794 = vmatprep.subr.mxu0 %v6186_v11 }
 0x9fd   : > { %5772 = vmatmul.mubr.msk.f32.vlgmr.msra.gmra.mrb[36].mxu1 %vm1566_vm2, %v2943_v62  ;;  %v5157_v62 = vld [vmem:[%s7231_s7 + $0x7] ss:$0 sm:$0xff] }
 0x9fe   : > { %5781 = vmatprep.mubr.msk.f32.mxu1 %vm6185_vm0, %v6186_v11 }
 0x9ff   : > { %v3408_v0 = vpop.f32.mrb[36].mxu0  ;;  %v7026_v1 = vpop.f32.mrb[32].mxu1 }
 0xa00   : > { %v3409_v4 = vadd.f32 %v5129_v63, %v3408_v0  ;;  %v5719_v5 = vpop.f32.mrb[37].mxu0  ;;  %v5752_v6 = vpop.f32.mrb[33].mxu1  ;;  %v3665_v56 = vadd.f32 %v5156_v53, %v7026_v1 }
 0xa01   : > { %v5174_v5 = vld [vmem:[%s7232_s8 + $0x20] sm:$0xff]  ;;  %v5175_v6 = vld [vmem:[%s7232_s8 + $0x28] sm:$0xff] }
 0xa02   : > { %5780 = vmatpush3.xpose.msk.msra.mxu1 %vm1566_vm2, %v3409_v4 }
 0xa03   : > { %5789 = vmatprep.subr.mxu1 %v6186_v11 }
 0xa05   : > { %5782 = vmatmul.mubr.msk.f32.vlgmr.msra.gmra.mrb[38].mxu1 %vm1566_vm2, %v3083_v7  ;;  %v5176_v7 = vld [vmem:[%s7232_s8 + $0x30] sm:$0xff] }
 0xa06   : > { %5791 = vmatprep.mubr.msk.f32.mxu1 %vm6185_vm0, %v6186_v11 }
 0xa07   : > { %v3594_v9 = vpop.f32.mrb[38].mxu0 }
 0xa08   : > { %v3595_v10 = vadd.f32 %v5155_v8, %v3594_v9  ;;  %v5741_v12 = vpop.f32.mrb[39].mxu0 }
 0xa0a   : > { %5790 = vmatpush3.msra.mxu1 %v3595_v10 }
 0xa0b   : > { %5799 = vmatprep.subr.mxu1 %v6186_v11 }
 0xa0f   : > { %v7040_v13 = vpop.f32.mrb[40].mxu0 }
 0xa10   : > { %v5763_v14 = vpop.f32.mrb[41].mxu0  ;;  %v3735_v1 = vadd.f32 %v5157_v62, %v7040_v13  ;;  %v5177_v13 = vld [vmem:[%s7232_s8 + $0x38] sm:$0xff]  ;;  %v5199_v62 = vld [vmem:[%s7238_s14 + $0x60] sm:$0xff] }
 0xac0   : > { %v3810_v15 = vpop.f32.mrb[34].mxu1 }
 0xac1   : > { %v3811_v16 = vadd.f32 %v3810_v15, %v6626_v58  ;;  %v5768_v17 = vpop.f32.mrb[35].mxu1 }
 0xac3   : > { %v4042_v19 = vsel %vm1566_vm2, %v3811_v16, -inf }
 0xac4   : > { %4043 = vmax.xlane.f32.xlu0 %v4042_v19 }
 0xac8   : > { %v3962_v20 = vpop.f32.mrb[42].mxu0 }
 0xac9   : > { %v3963_v21 = vadd.f32 %v3962_v20, %v6626_v58  ;;  %v5778_v22 = vpop.f32.mrb[43].mxu0 }
 0xacb   : > { %v4048_v23 = vsel %vm1566_vm2, %v3963_v21, -inf }
 0xacc   : > { %4049 = vmax.xlane.f32.xlu0 %v4048_v23 }
 0xad0   : > { %v3886_v24 = vpop.f32.mrb[36].mxu1 }
 0xad1   : > { %v3887_v25 = vadd.f32 %v3886_v24, %v6626_v58  ;;  %v5773_v26 = vpop.f32.mrb[37].mxu1 }
 0xad3   : > { %v4045_v27 = vsel %vm1566_vm2, %v3887_v25, -inf }
 0xad4   : > { %4046 = vmax.xlane.f32.xlu1 %v4045_v27 }
 0xad8   : > { %v4038_v28 = vpop.f32.mrb[38].mxu1 }
 0xad9   : > { %v4039_v18 = vadd.f32 %v4038_v28, %v6626_v58  ;;  %v5783_v29 = vpop.f32.mrb[39].mxu1 }
 0xadb   : > { %v4051_v30 = vsel %vm1566_vm2, %v4039_v18, -inf }
 0xadc   : > { %4052 = vmax.xlane.f32.xlu1 %v4051_v30 }
 0xb51   : > { %v4044_v31 = vpop.xlane.xlu0 %4043 }
 0xb52   : > { %v4054_v32 = vsub.f32 %v3811_v16, %v4044_v31 }
 0xb54   : > { %v4058_v33 = vmul.f32 1.442695, %v4054_v32 }
 0xb56   : > { %6098 = vpow2.f32 %v4058_v33 }
 0xb59   : > { %v4050_v34 = vpop.xlane.xlu0 %4049 }
 0xb5a   : > { %v4056_v35 = vsub.f32 %v3963_v21, %v4050_v34 }
 0xb5c   : > { %v4062_v36 = vmul.f32 1.442695, %v4056_v35 }
 0xb5e   : > { %6100 = vpow2.f32 %v4062_v36 }
 0xb60   : > { %v6099_v37 = vpop.eup %6098 }
 0xb61   : > { %v4047_v39 = vpop.xlane.xlu1 %4046  ;;  %v4066_v40 = vsel %vm1566_vm2, %v6099_v37, 0.0 }
 0xb62   : > { %v4055_v41 = vsub.f32 %v3887_v25, %v4047_v39  ;;  %4067 = vadd.xlane.f32.xlu0 %v4066_v40 }
 0xb64   : > { %v4060_v42 = vmul.f32 1.442695, %v4055_v41 }
 0xb66   : > { %6102 = vpow2.f32 %v4060_v42  ;;  %v5188_v42 = vld [vmem:[%s7236_s12 + $0x20] sm:$0xff] }
 0xb68   : > { %v6101_v58 = vpop.eup %6100 }
 0xb69   : > { %v4053_v43 = vpop.xlane.xlu1 %4052  ;;  %v4072_v44 = vsel %vm1566_vm2, %v6101_v58, 0.0 }
 0xb6a   : > { %v4057_v45 = vsub.f32 %v4039_v18, %v4053_v43  ;;  %4073 = vadd.xlane.f32.xlu0 %v4072_v44  ;;  %v5191_v44 = vld [vmem:[%s7236_s12 + $0x38] sm:$0xff] }
 0xb6c   : > { %v4064_v46 = vmul.f32 1.442695, %v4057_v45 }
 0xb6e   : > { %6104 = vpow2.f32 %v4064_v46 }
 0xb70   : > { %v6103_v47 = vpop.eup %6102 }
 0xb71   : > { %v4069_v48 = vsel %vm1566_vm2, %v6103_v47, 0.0 }
 0xb72   : > { %4070 = vadd.xlane.f32.xlu1 %v4069_v48 }
 0xb78   : > { %v6105_v49 = vpop.eup %6104 }
 0xb79   : > { %v4075_v50 = vsel %vm1566_vm2, %v6105_v49, 0.0 }
 0xb7a   : > { %4076 = vadd.xlane.f32.xlu1 %v4075_v50  ;;  %v5186_v50 = vld [vmem:[%s7234_s10 + $0x1] ss:$0 sm:$0xff] }
 0xbef   : > { %v4068_v51 = vpop.xlane.xlu0 %4067 }
 0xbf0   : > { %6106 = vrcp.f32 %v4068_v51 }
 0xbf7   : > { %v4074_v52 = vpop.xlane.xlu0 %4073 }
 0xbf8   : > { %6108 = vrcp.f32 %v4074_v52  ;;  %v5187_v52 = vld [vmem:[%s7235_s11 + $0x1] ss:$0 sm:$0xff] }
 0xbfa   : > { %v6107_v54 = vpop.eup %6106 }
 0xbfb   : > { %v4082_v55 = vmul.f32 %v6107_v54, %v6099_v37 }
 0xbfd   : > { %5787 = vmatmul.mubr.msk.f32.vlgmr.msra.gmra.mrb[44].mxu0 %vm1566_vm2, %v4082_v55  ;;  %v5195_v55 = vld [vmem:[%s7238_s14 + $0x40] sm:$0xff] }
 0xbfe   : > { %5795 = vmatpush3.msra.mxu0 %v3665_v56  ;;  %5796 = vmatprep.mubr.msk.f32.mxu0 %vm6185_vm0, %v6186_v11  ;;  %v5196_v56 = vld [vmem:[%s7238_s14 + $0x48] sm:$0xff] }
 0xbff   : > { %v4071_v57 = vpop.xlane.xlu1 %4070  ;;  %5804 = vmatprep.subr.mxu0 %v6186_v11 }
 0xc00   : > { %6110 = vrcp.f32 %v4071_v57  ;;  %v6023_v57 = vpack.c.bf16 %v5196_v56, %v5195_v55 }
 0xc02   : > { %v6109_v59 = vpop.eup %6108 }
 0xc03   : > { %v4084_v60 = vmul.f32 %v6109_v59, %v6101_v58  ;;  %v5189_v58 = vld [vmem:[%s7236_s12 + $0x28] sm:$0xff]  ;;  %v5197_v59 = vld [vmem:[%s7238_s14 + $0x50] sm:$0xff] }
 0xc04   : > { %v6017_v43 = vpack.c.bf16 %v5189_v58, %v5188_v42 }
 0xc05   : > { %5797 = vmatmul.mubr.msk.f32.vlgmr.msra.gmra.mrb[46].mxu0 %vm1566_vm2, %v4084_v60  ;;  %v5198_v60 = vld [vmem:[%s7238_s14 + $0x58] sm:$0xff] }
 0xc06   : > { %5806 = vmatprep.mubr.msk.f32.mxu0 %vm6185_vm0, %v6186_v11  ;;  %5805 = vmatpush3.msra.mxu0 %v5174_v5  ;;  %v5193_v5 = vld [vmem:[%s7237_s13 + $0x1] ss:$0 sm:$0xff] }
 0xc07   : > { %v4077_v61 = vpop.xlane.xlu1 %4076  ;;  %5814 = vmatprep.subr.mxu0 %v6186_v11 }
 0xc08   : > { %6112 = vrcp.f32 %v4077_v61  ;;  %v6026_v61 = vpack.c.bf16 %v5198_v60, %v5197_v59 }
 0xc0a   : > { %v6111_v63 = vpop.eup %6110 }
 0xc0b   : > { %v4083_v0 = vmul.f32 %v6111_v63, %v6103_v47  ;;  %v5200_v63 = vld [vmem:[%s7238_s14 + $0x68] sm:$0xff] }
 0xc0d   : > { %5792 = vmatmul.mubr.msk.f32.vlgmr.msra.gmra.mrb[40].mxu1 %vm1566_vm2, %v4083_v0  ;;  %v6029_v0 = vpack.c.bf16 %v5200_v63, %v5199_v62 }
 0xc0e   : > { %5800 = vmatpush3.msra.mxu1 %v3735_v1  ;;  %5801 = vmatprep.mubr.msk.f32.mxu1 %vm6185_vm0, %v6186_v11  ;;  %v5201_v1 = vld [vmem:[%s7238_s14 + $0x70] sm:$0xff] }
 0xc0f   : > { %5809 = vmatprep.subr.mxu1 %v6186_v11 }
 0xc12   : > { %v6113_v2 = vpop.eup %6112 }
 0xc13   : > { %v4085_v4 = vmul.f32 %v6113_v2, %v6105_v49  ;;  %v5202_v2 = vld [vmem:[%s7238_s14 + $0x78] sm:$0xff] }
 0xc15   : > { %5802 = vmatmul.mubr.msk.f32.vlgmr.msra.gmra.mrb[42].mxu1 %vm1566_vm2, %v4085_v4  ;;  %v6032_v4 = vpack.c.bf16 %v5202_v2, %v5201_v1 }
 0xc16   : > { %5811 = vmatprep.mubr.msk.f32.mxu1 %vm6185_vm0, %v6186_v11  ;;  %5810 = vmatpush3.msra.mxu1 %v5175_v6 }
 0xc17   : > { %5819 = vmatprep.subr.mxu1 %v6186_v11 }
 0xcd0   : > { %v4155_v8 = vpop.f32.mrb[44].mxu0 }
 0xcd1   : > { %v5788_v9 = vpop.f32.mrb[45].mxu0  ;;  %5807 = vmatmul.mubr.msk.f32.vlgmr.msra.gmra.mrb[48].mxu0 %vm1566_vm2, %v4155_v8 }
 0xcd2   : > { %5815 = vmatpush3.msra.mxu0 %v5176_v7  ;;  %5816 = vmatprep.mubr.msk.f32.mxu0 %vm6185_vm0, %v6186_v11 }
 0xcd3   : > { %6016 = vmatprep.subr.bf16.mxu0 %v6184_v3 }
 0xcd8   : > { %v4301_v10 = vpop.f32.mrb[46].mxu0 }
 0xcd9   : > { %v5798_v12 = vpop.f32.mrb[47].mxu0  ;;  %5817 = vmatmul.mubr.msk.f32.vlgmr.msra.gmra.mrb[50].mxu0 %vm1566_vm2, %v4301_v10 }
 0xcda   : > { %5832 = vmatprep.mubr.msk.f32.mxu0 %vm6185_vm0, %v6186_v11  ;;  %6018 = vmatpush3.bf16.msra.mxu0 %v6017_v43 }
 0xcdb   : > { %6019 = vmatprep.subr.bf16.mxu0 %v6184_v3 }
 0xce0   : > { %v4228_v14 = vpop.f32.mrb[40].mxu1 }
 0xce1   : > { %v5793_v15 = vpop.f32.mrb[41].mxu1  ;;  %5812 = vmatmul.mubr.msk.f32.vlgmr.msra.gmra.mrb[44].mxu1 %vm1566_vm2, %v4228_v14  ;;  %v5204_v14 = vld [vmem:[%s7239_s15 + $0x1] ss:$0 sm:$0xff] }
 0xce2   : > { %5820 = vmatpush3.msra.mxu1 %v5177_v13  ;;  %5821 = vmatprep.mubr.msk.f32.mxu1 %vm6185_vm0, %v6186_v11 }
 0xce3   : > { %6022 = vmatprep.subr.bf16.mxu1 %v6184_v3 }
 0xce8   : > { %v4374_v16 = vpop.f32.mrb[42].mxu1 }
 0xce9   : > { %v5803_v17 = vpop.f32.mrb[43].mxu1  ;;  %5822 = vmatmul.mubr.msk.f32.vlgmr.msra.gmra.mrb[46].mxu1 %vm1566_vm2, %v4374_v16 }
 0xcea   : > { %5851 = vmatprep.mubr.msk.f32.mxu1 %vm6185_vm0, %v6186_v11  ;;  %v5183_v11 = vld [vmem:[%s7233_s9 + $0x1] ss:$0 sm:$0xff]  ;;  %6024 = vmatpush3.bf16.msra.mxu1 %v6023_v57 }
 0xceb   : > { %6025 = vmatprep.subr.bf16.mxu1 %v6184_v3 }
 0xcee   : > { %6027 = vmatpush3.bf16.msra.mxu1 %v6026_v61 }
 0xcef   : > { %6028 = vmatprep.subr.bf16.mxu1 %v6184_v3 }
 0xcf2   : > { %6030 = vmatpush3.bf16.msra.mxu1 %v6029_v0 }
 0xcf3   : > { %6031 = vmatprep.subr.bf16.mxu1 %v6184_v3 }
 0xcf6   : > { %6033 = vmatpush3.bf16.msra.mxu1 %v6032_v4 }
 0xda4   : > { %v4452_v19 = vpop.f32.mrb[48].mxu0 }
 0xda5   : > { %v5808_v20 = vpop.f32.mrb[49].mxu0  ;;  %v4675_v24 = vsel %vm634_vm1, %v4452_v19, 0.0 }
 0xdac   : > { %v4598_v21 = vpop.f32.mrb[50].mxu0 }
 0xdad   : > { %v5818_v22 = vpop.f32.mrb[51].mxu0  ;;  %v4678_v28 = vsel %vm634_vm1, %v4598_v21, 0.0 }
 0xdb4   : > { %v4525_v23 = vpop.f32.mrb[44].mxu1 }
 0xdb5   : > { %v4676_v25 = vsel %vm634_vm1, %v4525_v23, 0.0  ;;  %v5813_v26 = vpop.f32.mrb[45].mxu1 }
 0xdb6   : > { %v4677_v27 = vadd.f32 %v4676_v25, %v4675_v24 }
 0xdb8   : > { %v4679_v18 = vadd.f32 %v4678_v28, %v4677_v27 }
 0xdbc   : > { %v4671_v29 = vpop.f32.mrb[46].mxu1 }
 0xdbd   : > { %v4680_v30 = vsel %vm634_vm1, %v4671_v29, 0.0  ;;  %v5823_v31 = vpop.f32.mrb[47].mxu1  ;;  %v5208_v29 = vld [vmem:[%s7240_s16 + $0x1] ss:$0 sm:$0xff] }
 0xdbe   : > { %v4681_v32 = vadd.f32 %v4680_v30, %v4679_v18 }
 0xdc0   : > { %v4690_v33 = vadd.f32 %v5183_v11, %v4681_v32  ;;  %v5209_v11 = vld [vmem:[%s7241_s17 + $0x1] ss:$0 sm:$0xff] }
 0xdc2   : > { %v4691_v34 = vadd.f32 %v4690_v33, %v6811_v38  ;;  %v5190_v38 = vld [vmem:[%s7236_s12 + $0x30] sm:$0xff] }
 0xdc3   : > { %v6020_v45 = vpack.c.bf16 %v5191_v44, %v5190_v38 }
 0xdc4   : > { %v4696_v35 = vsel %vm634_vm1, %v4691_v34, 0.0 }
 0xdc5   : > { %4697 = vadd.xlane.f32.xlu0 %v4696_v35  ;;  %6021 = vmatpush3.bf16.msra.mxu0 %v6020_v45 }
 0xe52   : > { %v4698_v36 = vpop.xlane.xlu0 %4697 }
 0xe53   : > { %v4699_v37 = vmul.f32 0.03125, %v4698_v36 }
 0xe55   : > { %v4700_v39 = vsub.f32 %v4691_v34, %v4699_v37 }
 0xe57   : > { %v4701_v40 = vmul.f32 %v4700_v39, %v4700_v39 }
 0xe59   : > { %v4702_v41 = vsel %vm634_vm1, %v4701_v40, 0.0 }
 0xe5a   : > { %4703 = vadd.xlane.f32.xlu1 %v4702_v41 }
 0xee7   : > { %v4704_v46 = vpop.xlane.xlu1 %4703 }
 0xee8   : > { %v4705_v47 = vmul.f32 0.03125, %v4704_v46 }
 0xeea   : > { %v4706_v48 = vadd.f32 1e-12, %v4705_v47 }
 0xeec   : > { %6114 = vrsqrt.f32 %v4706_v48 }
 0xef6   : > { %v6115_v49 = vpop.eup %6114 }
 0xef7   : > { %v4708_v51 = vmul.f32 %v6115_v49, %v4700_v39 }
 0xef9   : > { %v4715_v53 = vmul.f32 %v5186_v50, %v4708_v51 }
 0xefb   : > { %v4722_v54 = vadd.f32 %v5187_v52, %v4715_v53 }
 0xefd   : > { %5833 = vmatmul.mubr.msk.f32.vlgmr.msra.gmra.mrb[52].mxu0 %vm634_vm1, %v4722_v54 }
 0xfd0   : > { %v4805_v6 = vpop.f32.mrb[52].mxu0 }
 0xfd1   : > { %v4806_v7 = vadd.f32 %v5193_v5, %v4805_v6  ;;  %v5834_v8 = vpop.f32.mrb[53].mxu0 }
 0xfd3   : > { %v4810_v9 = vmul.f32 0.70710677, %v4806_v7  ;;  %v4809_v10 = vmul.f32 0.5, %v4806_v7 }
 0xfd5   : > { %6116 = verf.f32 %v4810_v9 }
 0xfdf   : > { %v6117_v3 = vpop.eup %6116 }
 0xfe0   : > { %v4812_v12 = vadd.f32 1.0, %v6117_v3 }
 0xfe2   : > { %v4813_v13 = vmul.f32 %v4812_v12, %v4809_v10 }
 0xfe4   : > { %5852 = vmatmul.mubr.msk.f32.vlgmr.msra.gmra.mrb[48].mxu1 %vm2653_vm3, %v4813_v13 }
0x10b7   : > { %v4900_v15 = vpop.f32.mrb[48].mxu1 }
0x10b8   : > { %v4901_v16 = vadd.f32 %v5204_v14, %v4900_v15  ;;  %v5853_v17 = vpop.f32.mrb[49].mxu1 }
0x10ba   : > { %v4904_v19 = vadd.f32 %v4901_v16, %v4722_v54 }
0x10bc   : > { %v4909_v20 = vsel %vm634_vm1, %v4904_v19, 0.0 }
0x10bd   : > { %4910 = vadd.xlane.f32.xlu0 %v4909_v20 }
0x114a   : > { %v4911_v21 = vpop.xlane.xlu0 %4910 }
0x114b   : > { %v4912_v22 = vmul.f32 0.03125, %v4911_v21 }
0x114d   : > { %v4913_v23 = vsub.f32 %v4904_v19, %v4912_v22 }
0x114f   : > { %v4914_v24 = vmul.f32 %v4913_v23, %v4913_v23 }
0x1151   : > { %v4915_v25 = vsel %vm634_vm1, %v4914_v24, 0.0 }
0x1152   : > { %4916 = vadd.xlane.f32.xlu1 %v4915_v25 }
0x11df   : > { %v4917_v26 = vpop.xlane.xlu1 %4916 }
0x11e0   : > { %v4918_v27 = vmul.f32 0.03125, %v4917_v26 }
0x11e2   : > { %v4919_v28 = vadd.f32 1e-12, %v4918_v27 }
0x11e4   : > { %6118 = vrsqrt.f32 %v4919_v28 }
0x11ee   : > { %v6119_v18 = vpop.eup %6118 }
0x11ef   : > { %v4921_v30 = vmul.f32 %v6119_v18, %v4913_v23 }
0x11f1   : > { %v4928_v31 = vmul.f32 %v5208_v29, %v4921_v30 }
0x11f3   : > { %v4935_v32 = vadd.f32 %v5209_v11, %v4928_v31 }
0x11f5   : > { %4936 = vst.msk [vmem:[%s579_s21] sm:$0xff] %vm634_vm1, %v4935_v32 }
0x11f6   : > { %6133 = shalt.err (!%p6130_p3)
}
0x11f7   : > { %s6134_s19 = scalar_lea.hbm %s7181_s3, 128  ;;  %s6138_s21 = scalar_lea.hbm %s7268_s24, 256 }
0x11f8   : > { %p6135_p4 = scmp.ne.s32.totalorder %s7181_s3, %s6134_s19  ;;  %p6139_p9 = scmp.lt.u32.totalorder %s7181_s3, %s7268_s24 }
0x11f9   : > { %p6140_p10 = scmp.lt.u32.totalorder %s6138_s21, %s6134_s19  ;;  %p6142_p12 = scmp.lt.u32.totalorder %s6134_s19, %s7181_s3 }
0x11fa   : > { %p6136_p7 = pnand %p6135_p4, %p6321_p5 }
0x11fb   : > { %p6141_p11 = por %p6140_p10, %p6139_p9 }
0x11fc   : > { %p6137_p8 = pneg %p6136_p7 }
0x11fd   : > { %p6143_p13 = por %p6142_p12, %p6141_p11 }
0x11ff   : > { %p6144_p0 = pnand %p6143_p13, %p6137_p8 }
0x1201   : > { %6147 = shalt.err (!%p6144_p0)
}
0x1202   : > { %6034 = dma.vmem_to_hbm [thread:$0]  (%p6321_p5), %s7183_s27, 128, %s7181_s3, %s4938_s18  }
0x1203 PF: > { %s7269_s30 = sld [smem:[#allocation7_spill]]  ;;  %s7270_s0 = sld [smem:[#allocation5_spill]] }
0x1209   : > { %p6040_p1 = scmp.ge.s32.totalorder %s7269_s30, 2  ;;  %s4963_s29 = sand.u32 1, %s7270_s0  }
0x120a   : > { %s4964_s25 = scalar_lea.sflag [#allocation3], %s4963_s29 }
0x120b   : > { %p6037_p2 = pnand %p6040_p1, %p6325_p6 }
0x120d   : > { %6165 = dma.done.wait (!%p6037_p2), %s4964_s25, 128  }
0x120e   : > { %6167 = vsyncadd (!%p6037_p2), %s4964_s25, 4294967168  ;;  %s7272_s30 = sld [smem:[#allocation8_spill]]  ;;  %s7273_s19 = sld [smem:[#allocation6_spill]] }
0x120f   : > { %s7274_s29 = sld [smem:[#allocation9_spill]]  ;;  %s7275_s27 = smov %s6174_s28 }
0x1214   : > { %p28_p3 = scmp.ge.s32.totalorder %s7272_s30, 4   ;;  %s7276_s28 = smov %s7273_s19 }
0x1216   :  { %30 = sbr.rel (!%p28_p3) target bundleno = 9 (0x9), region = 146 }
0x121d   :  { %4969 = vsyncpa [#allocation3], 1 }
0x121e   :  { %4971 = vsyncpa [#allocation3 + $0x1], 1 }

</bundles_post_ra>
